<compile_context>
chip_gen: v5e
topology: v5e:2x2
jax: 0.10.0
libtpu: 0.0.40
codegen_flags: <defaults>
</compile_context>

<pallas_src>
import functools

import jax
import jax.numpy as jnp
from jax.experimental import pallas as pl
from jax.experimental.pallas import tpu as pltpu

ANCHORS_PER_CELL = 3
TOTAL_BBOX_ELEMENTS = 5
LEAKY_SLOPE = 0.1
BN_EPS = 1e-5


def _scale_pred_kernel(x_ref, w1_ref, shift_ref, w2_ref, b2_ref, o_ref):
    """One batch element per grid step.

    x_ref    : (1, H+2, W+2, Cin)  bf16  zero-padded NHWC input tile
    w1_ref   : (3, 3*Cin, C1)      bf16  3x3 conv weights, [dx][dy*Cin+c, o],
                                         BN scale pre-folded (f32 fold -> bf16)
    shift_ref: (1, C1)             f32   folded BN shift
    w2_ref   : (C1, Cout_pad)      bf16  1x1 conv weights (zero-padded cols)
    b2_ref   : (1, Cout_pad)       f32   1x1 conv bias (zero-padded)
    o_ref    : (1, H*W, Cout_pad)  bf16  lane-dense output tile
    """
    hp2, wp2, cin = x_ref.shape[1], x_ref.shape[2], x_ref.shape[3]
    h, w = hp2 - 2, wp2 - 2

    xb = x_ref[0]                                         # (H+2, W+2, Cin)

    # dy taps are leading-dim slices (cheap); one 3-way lane concat.
    ycat = jnp.concatenate([xb[0:h], xb[1:h + 1], xb[2:h + 2]], axis=-1)
    # ycat: (H, W+2, 3*Cin), column k = dy*Cin + c.

    # conv1 (3x3) as 3 accumulated GEMMs over dx (K = 3*Cin), f32 accumulation.
    acc = None
    for dx in range(3):
        lhs = ycat[:, dx:dx + w, :].reshape(h * w, 3 * cin)
        part = jnp.dot(lhs, w1_ref[dx], preferred_element_type=jnp.float32)
        acc = part if acc is None else acc + part

    # BN scale already folded into w1; only the shift remains.
    act = acc + shift_ref[...]
    # LeakyReLU(0.1) as mul + max (2 VALU ops instead of cmp+mul+select).
    act = jnp.maximum(act, LEAKY_SLOPE * act)

    # conv2 (1x1) as a second bf16 GEMM + bias (bias columns >= Cout are zero).
    out = jnp.dot(act.astype(jnp.bfloat16), w2_ref[...],
                  preferred_element_type=jnp.float32) + b2_ref[...]

    # Lane-dense unmasked store: last dim Cout_pad is a multiple of 128.
    o_ref[...] = out[None].astype(o_ref.dtype)


@functools.partial(jax.jit, static_argnames=("num_classes",))
def scale_prediction(x_nchw, params, *, num_classes):
    """Forward pass. x_nchw: (B, Cin, H, W) float32. Returns (B, 3, H, W, nc+5) f32."""
    B, Cin, H, W = x_nchw.shape
    C1 = 2 * Cin
    Cout = ANCHORS_PER_CELL * (num_classes + TOTAL_BBOX_ELEMENTS)
    Cout_pad = ((Cout + 127) // 128) * 128                # lane-dense output pad

    w1, gamma, beta, run_mean, run_var, w2, b2 = (
        params["w1"], params["gamma"], params["beta"],
        params["run_mean"], params["run_var"], params["w2"], params["b2"],
    )

    # NCHW -> NHWC, bf16 cast, zero-pad spatial by 1 (conv padding=1).
    x = jnp.transpose(x_nchw, (0, 2, 3, 1)).astype(jnp.bfloat16)
    x_pad = jnp.pad(x, ((0, 0), (1, 1), (1, 1), (0, 0)))

    # Fold BatchNorm (inference, running stats) into conv1 weights, in f32.
    scale = gamma / jnp.sqrt(run_var + BN_EPS)            # (C1,)
    shift = beta - run_mean * scale                       # (C1,)
    # w1 (kH=dy, kW=dx, Cin, C1) -> (dx, dy, Cin, C1) -> (3, 3*Cin, C1) slabs.
    w1_k = (jnp.transpose(w1, (1, 0, 2, 3)) * scale).reshape(3, 3 * Cin, C1)
    w1_k = w1_k.astype(jnp.bfloat16)
    shift_k = shift.reshape(1, C1).astype(jnp.float32)

    # w2 (Cout, C1) -> (C1, Cout_pad) with zero-padded columns, bf16; b2 padded.
    w2_k = jnp.zeros((C1, Cout_pad), jnp.float32).at[:, :Cout].set(w2.T)
    w2_k = w2_k.astype(jnp.bfloat16)
    b2_k = jnp.zeros((1, Cout_pad), jnp.float32).at[0, :Cout].set(b2)

    out_flat = pl.pallas_call(
        _scale_pred_kernel,
        out_shape=jax.ShapeDtypeStruct((B, H * W, Cout_pad), jnp.bfloat16),
        grid_spec=pltpu.PrefetchScalarGridSpec(
            num_scalar_prefetch=0,
            grid=(B,),
            in_specs=[
                # One padded image per step; auto-pipelined (next batch's DMA
                # overlaps the current batch's compute).
                pl.BlockSpec((1, H + 2, W + 2, Cin), lambda b: (b, 0, 0, 0)),
                # Constant index maps -> weights stay resident in VMEM.
                pl.BlockSpec((3, 3 * Cin, C1), lambda b: (0, 0, 0)),
                pl.BlockSpec((1, C1), lambda b: (0, 0)),
                pl.BlockSpec((C1, Cout_pad), lambda b: (0, 0)),
                pl.BlockSpec((1, Cout_pad), lambda b: (0, 0)),
            ],
            out_specs=pl.BlockSpec((1, H * W, Cout_pad), lambda b: (b, 0, 0)),
        ),
        compiler_params=pltpu.CompilerParams(
            dimension_semantics=("parallel",),   # megacore shards batch
            vmem_limit_bytes=48 * 1024 * 1024,   # fits every YOLO head; <=48 MiB
        ),                                       # leaves headroom on v7x's 64 MiB
    )(x_pad, w1_k, shift_k, w2_k, b2_k)

    # Slice off channel pad, split anchors, permute, cast back to f32 — one
    # fused XLA pass reading the bf16 kernel output.
    # Matches PyTorch's view(B, 3, nc+5, H, W).permute(0, 1, 3, 4, 2).
    out = out_flat[:, :, :Cout].reshape(B, H, W, ANCHORS_PER_CELL,
                                        num_classes + TOTAL_BBOX_ELEMENTS)
    out = jnp.transpose(out, (0, 3, 1, 2, 4)).astype(jnp.float32)
    return out


def init_params(key, in_chs, num_classes):
    """Deterministic synthetic parameters (shapes match the PyTorch module)."""
    C1 = 2 * in_chs
    Cout = ANCHORS_PER_CELL * (num_classes + TOTAL_BBOX_ELEMENTS)
    ks = jax.random.split(key, 6)
    return {
        # 3x3 conv weight stored as (KH, KW, Cin, C1)
        "w1": jax.random.normal(ks[0], (3, 3, in_chs, C1), jnp.float32) * 0.1,
        "gamma": 1.0 + 0.1 * jax.random.normal(ks[1], (C1,), jnp.float32),
        "beta": 0.1 * jax.random.normal(ks[2], (C1,), jnp.float32),
        "run_mean": 0.1 * jax.random.normal(ks[3], (C1,), jnp.float32),
        "run_var": jnp.abs(1.0 + 0.1 * jax.random.normal(ks[4], (C1,), jnp.float32)),
        # 1x1 conv weight in PyTorch layout (Cout, C1) + bias
        "w2": jax.random.normal(ks[5], (Cout, C1), jnp.float32) * 0.1,
        "b2": jnp.linspace(-0.1, 0.1, Cout, dtype=jnp.float32),
    }


def _reference(x_nchw, params, num_classes):
    """Pure-JAX f32 reference of the same forward pass."""
    B, Cin, H, W = x_nchw.shape
    C1 = 2 * Cin
    Cout = ANCHORS_PER_CELL * (num_classes + TOTAL_BBOX_ELEMENTS)
    w1 = jnp.transpose(params["w1"], (3, 2, 0, 1))  # (C1, Cin, 3, 3) OIHW
    y = jax.lax.conv_general_dilated(
        x_nchw, w1, window_strides=(1, 1), padding=((1, 1), (1, 1)),
        dimension_numbers=("NCHW", "OIHW", "NCHW"))
    scale = params["gamma"] / jnp.sqrt(params["run_var"] + BN_EPS)
    shift = params["beta"] - params["run_mean"] * scale
    y = y * scale[None, :, None, None] + shift[None, :, None, None]
    y = jnp.where(y > 0, y, LEAKY_SLOPE * y)
    w2 = params["w2"].reshape(Cout, C1, 1, 1)
    y = jax.lax.conv_general_dilated(
        y, w2, window_strides=(1, 1), padding=((0, 0), (0, 0)),
        dimension_numbers=("NCHW", "OIHW", "NCHW"))
    y = y + params["b2"][None, :, None, None]
    y = y.reshape(B, ANCHORS_PER_CELL, num_classes + TOTAL_BBOX_ELEMENTS, H, W)
    return jnp.transpose(y, (0, 1, 3, 4, 2))


if __name__ == "__main__":
    B, in_chs, H, W = 2, 4, 16, 16
    num_classes = 3

    key = jax.random.PRNGKey(0)
    kx, kp = jax.random.split(key)
    x = jax.random.normal(kx, (B, in_chs, H, W), jnp.float32)
    params = init_params(kp, in_chs, num_classes)

    out = scale_prediction(x, params, num_classes=num_classes)
    out = jax.block_until_ready(out)

    expected_shape = (B, ANCHORS_PER_CELL, H, W, num_classes + TOTAL_BBOX_ELEMENTS)
    assert out.shape == expected_shape, (out.shape, expected_shape)

    ref = jax.block_until_ready(_reference(x, params, num_classes))
    # bf16 input/weights/output-store vs pure-f32 reference => loose tolerance.
    max_err = float(jnp.max(jnp.abs(out - ref)))
    assert jnp.allclose(out, ref, atol=4e-2, rtol=4e-2), max_err

    print("KERNEL_OK")
</pallas_src>

<mosaic_0001>
module attributes {stable_mosaic.version = 11 : i64} {
  func.func @_scale_pred_kernel(%arg0: i32, %arg1: memref<1x18x18x4xbf16, #tpu.memory_space<vmem>>, %arg2: memref<3x12x8xbf16, #tpu.memory_space<vmem>>, %arg3: memref<1x8xf32, #tpu.memory_space<vmem>>, %arg4: memref<8x128xbf16, #tpu.memory_space<vmem>>, %arg5: memref<1x128xf32, #tpu.memory_space<vmem>>, %arg6: memref<1x256x128xbf16, #tpu.memory_space<vmem>>) attributes {dimension_semantics = [#tpu.dimension_semantics<parallel>], iteration_bounds = array<i64: 2>, scalar_prefetch = 0 : i64, scratch_operands = 0 : i64, tpu.core_type = #tpu.core_type<tc>, window_params = [{transform_indices = @transform_0, window_bounds = array<i64: 1, 18, 18, 4>}, {pipeline_mode = #tpu.pipeline_mode<synchronous>, transform_indices = @transform_1, window_bounds = array<i64: 3, 12, 8>}, {pipeline_mode = #tpu.pipeline_mode<synchronous>, transform_indices = @transform_2, window_bounds = array<i64: 1, 8>}, {pipeline_mode = #tpu.pipeline_mode<synchronous>, transform_indices = @transform_3, window_bounds = array<i64: 8, 128>}, {pipeline_mode = #tpu.pipeline_mode<synchronous>, transform_indices = @transform_4, window_bounds = array<i64: 1, 128>}, {transform_indices = @transform_5, window_bounds = array<i64: 1, 256, 128>}]} {
    %c0 = arith.constant 0 : index
    %c0_0 = arith.constant 0 : index
    %c0_1 = arith.constant 0 : index
    %c0_2 = arith.constant 0 : index
    %0 = vector.load %arg1[%c0, %c0_0, %c0_1, %c0_2] : memref<1x18x18x4xbf16, #tpu.memory_space<vmem>>, vector<1x18x18x4xbf16>
    %1 = vector.shape_cast %0 : vector<1x18x18x4xbf16> to vector<18x18x4xbf16>
    %2 = vector.extract_strided_slice %1 {offsets = [0, 0, 0], sizes = [16, 18, 4], strides = [1, 1, 1]} : vector<18x18x4xbf16> to vector<16x18x4xbf16>
    %3 = vector.extract_strided_slice %1 {offsets = [1, 0, 0], sizes = [16, 18, 4], strides = [1, 1, 1]} : vector<18x18x4xbf16> to vector<16x18x4xbf16>
    %4 = vector.extract_strided_slice %1 {offsets = [2, 0, 0], sizes = [16, 18, 4], strides = [1, 1, 1]} : vector<18x18x4xbf16> to vector<16x18x4xbf16>
    %5 = tpu.concatenate %2, %3, %4 in 2 : vector<16x18x4xbf16>, vector<16x18x4xbf16>, vector<16x18x4xbf16> -> vector<16x18x12xbf16>
    %6 = vector.extract_strided_slice %5 {offsets = [0, 0, 0], sizes = [16, 16, 12], strides = [1, 1, 1]} : vector<16x18x12xbf16> to vector<16x16x12xbf16>
    %7 = vector.shape_cast %6 : vector<16x16x12xbf16> to vector<256x12xbf16>
    %c0_3 = arith.constant 0 : index
    %c0_4 = arith.constant 0 : index
    %c0_5 = arith.constant 0 : index
    %8 = vector.load %arg2[%c0_3, %c0_4, %c0_5] : memref<3x12x8xbf16, #tpu.memory_space<vmem>>, vector<1x12x8xbf16>
    %9 = vector.shape_cast %8 : vector<1x12x8xbf16> to vector<12x8xbf16>
    %cst = arith.constant dense<0.000000e+00> : vector<256x8xf32>
    %10 = tpu.matmul %7, %9, %cst {dimension_numbers = #tpu.dot_dimension_numbers<[1], [0], [0], [1], [0, 0, 1, 1], [], []>} : vector<256x12xbf16>, vector<12x8xbf16>, vector<256x8xf32> -> vector<256x8xf32>
    %11 = vector.extract_strided_slice %5 {offsets = [0, 1, 0], sizes = [16, 16, 12], strides = [1, 1, 1]} : vector<16x18x12xbf16> to vector<16x16x12xbf16>
    %12 = vector.shape_cast %11 : vector<16x16x12xbf16> to vector<256x12xbf16>
    %c1 = arith.constant 1 : index
    %c0_6 = arith.constant 0 : index
    %c0_7 = arith.constant 0 : index
    %13 = vector.load %arg2[%c1, %c0_6, %c0_7] : memref<3x12x8xbf16, #tpu.memory_space<vmem>>, vector<1x12x8xbf16>
    %14 = vector.shape_cast %13 : vector<1x12x8xbf16> to vector<12x8xbf16>
    %cst_8 = arith.constant dense<0.000000e+00> : vector<256x8xf32>
    %15 = tpu.matmul %12, %14, %cst_8 {dimension_numbers = #tpu.dot_dimension_numbers<[1], [0], [0], [1], [0, 0, 1, 1], [], []>} : vector<256x12xbf16>, vector<12x8xbf16>, vector<256x8xf32> -> vector<256x8xf32>
    %16 = arith.addf %10, %15 : vector<256x8xf32>
    %17 = vector.extract_strided_slice %5 {offsets = [0, 2, 0], sizes = [16, 16, 12], strides = [1, 1, 1]} : vector<16x18x12xbf16> to vector<16x16x12xbf16>
    %18 = vector.shape_cast %17 : vector<16x16x12xbf16> to vector<256x12xbf16>
    %c2 = arith.constant 2 : index
    %c0_9 = arith.constant 0 : index
    %c0_10 = arith.constant 0 : index
    %19 = vector.load %arg2[%c2, %c0_9, %c0_10] : memref<3x12x8xbf16, #tpu.memory_space<vmem>>, vector<1x12x8xbf16>
    %20 = vector.shape_cast %19 : vector<1x12x8xbf16> to vector<12x8xbf16>
    %cst_11 = arith.constant dense<0.000000e+00> : vector<256x8xf32>
    %21 = tpu.matmul %18, %20, %cst_11 {dimension_numbers = #tpu.dot_dimension_numbers<[1], [0], [0], [1], [0, 0, 1, 1], [], []>} : vector<256x12xbf16>, vector<12x8xbf16>, vector<256x8xf32> -> vector<256x8xf32>
    %22 = arith.addf %16, %21 : vector<256x8xf32>
    %c0_12 = arith.constant 0 : index
    %c0_13 = arith.constant 0 : index
    %23 = vector.load %arg3[%c0_12, %c0_13] : memref<1x8xf32, #tpu.memory_space<vmem>>, vector<1x8xf32>
    %24 = vector.broadcast %23 : vector<1x8xf32> to vector<256x8xf32>
    %25 = arith.addf %22, %24 : vector<256x8xf32>
    %cst_14 = arith.constant 1.000000e-01 : f32
    %26 = vector.broadcast %cst_14 : f32 to vector<256x8xf32>
    %27 = arith.mulf %26, %25 : vector<256x8xf32>
    %28 = arith.maximumf %25, %27 : vector<256x8xf32>
    %29 = arith.truncf %28 : vector<256x8xf32> to vector<256x8xbf16>
    %c0_15 = arith.constant 0 : index
    %c0_16 = arith.constant 0 : index
    %30 = vector.load %arg4[%c0_15, %c0_16] : memref<8x128xbf16, #tpu.memory_space<vmem>>, vector<8x128xbf16>
    %cst_17 = arith.constant dense<0.000000e+00> : vector<256x128xf32>
    %31 = tpu.matmul %29, %30, %cst_17 {dimension_numbers = #tpu.dot_dimension_numbers<[1], [0], [0], [1], [0, 0, 1, 1], [], []>} : vector<256x8xbf16>, vector<8x128xbf16>, vector<256x128xf32> -> vector<256x128xf32>
    %c0_18 = arith.constant 0 : index
    %c0_19 = arith.constant 0 : index
    %32 = vector.load %arg5[%c0_18, %c0_19] : memref<1x128xf32, #tpu.memory_space<vmem>>, vector<1x128xf32>
    %33 = vector.broadcast %32 : vector<1x128xf32> to vector<256x128xf32>
    %34 = arith.addf %31, %33 : vector<256x128xf32>
    %35 = vector.shape_cast %34 : vector<256x128xf32> to vector<1x256x128xf32>
    %36 = arith.truncf %35 : vector<1x256x128xf32> to vector<1x256x128xbf16>
    %c0_20 = arith.constant 0 : index
    %c0_21 = arith.constant 0 : index
    %c0_22 = arith.constant 0 : index
    %37 = vector.load %arg6[%c0_20, %c0_21, %c0_22] : memref<1x256x128xbf16, #tpu.memory_space<vmem>>, vector<1x256x128xbf16>
    tpu.vector_store %arg6[%c0_20, %c0_21, %c0_22], %36 {strides = array<i32>} : memref<1x256x128xbf16, #tpu.memory_space<vmem>>, vector<1x256x128xbf16>,
    return
  }
  func.func @transform_0(%arg0: i32) -> (i32, i32, i32, i32) {
    %c0_i32 = arith.constant 0 : i32
    %c0_i32_0 = arith.constant 0 : i32
    %c0_i32_1 = arith.constant 0 : i32
    %c0_i32_2 = arith.constant 0 : i32
    return %arg0, %c0_i32, %c0_i32_0, %c0_i32_1 : i32, i32, i32, i32
  }
  func.func @transform_1(%arg0: i32) -> (i32, i32, i32) {
    %c0_i32 = arith.constant 0 : i32
    %c0_i32_0 = arith.constant 0 : i32
    %c0_i32_1 = arith.constant 0 : i32
    %c0_i32_2 = arith.constant 0 : i32
    return %c0_i32, %c0_i32_0, %c0_i32_1 : i32, i32, i32
  }
  func.func @transform_2(%arg0: i32) -> (i32, i32) {
    %c0_i32 = arith.constant 0 : i32
    %c0_i32_0 = arith.constant 0 : i32
    %c0_i32_1 = arith.constant 0 : i32
    return %c0_i32, %c0_i32_0 : i32, i32
  }
  func.func @transform_3(%arg0: i32) -> (i32, i32) {
    %c0_i32 = arith.constant 0 : i32
    %c0_i32_0 = arith.constant 0 : i32
    %c0_i32_1 = arith.constant 0 : i32
    return %c0_i32, %c0_i32_0 : i32, i32
  }
  func.func @transform_4(%arg0: i32) -> (i32, i32) {
    %c0_i32 = arith.constant 0 : i32
    %c0_i32_0 = arith.constant 0 : i32
    %c0_i32_1 = arith.constant 0 : i32
    return %c0_i32, %c0_i32_0 : i32, i32
  }
  func.func @transform_5(%arg0: i32) -> (i32, i32, i32) {
    %c0_i32 = arith.constant 0 : i32
    %c0_i32_0 = arith.constant 0 : i32
    %c0_i32_1 = arith.constant 0 : i32
    return %arg0, %c0_i32, %c0_i32_0 : i32, i32, i32
  }
}

</mosaic_0001>

<bundles_post_ra>
// kernel: scale_prediction.1
= control target key start
LH: loop header
LB: loop body
LE: loop exit
PB: predicated region body
PF: predicated region fallthrough
CT: control target
= control target key end

     0   :  { %s2130_s18 = smov 0   ;;  %s2677_s0 = inlined_call_operand.vmem [shape: bf16[2,18,18,4], index: 0, kind: input, shape index: {}]   ;;  %s2678_s1 = inlined_call_operand.vmem [shape: bf16[3,12,8], index: 1, kind: input, shape index: {}]   ;;  %s2679_s2 = inlined_call_operand.vmem [shape: f32[1,8], index: 2, kind: input, shape index: {}]   ;;  %s2680_s3 = inlined_call_operand.vmem [shape: bf16[8,128], index: 3, kind: input, shape index: {}]   ;;  %s2681_s4 = inlined_call_operand.vmem [shape: f32[1,128], index: 4, kind: input, shape index: {}]   ;;  %s2682_s5 = inlined_call_operand.vmem [shape: bf16[2,256,128], index: 5, kind: output, shape index: {}]  }
   0x1 LB: > { %s1798_s19 = sadd.s32 4294967295, %s2096_s18   ;;  %p1802_p0 = scmp.ge.s32.totalorder %s2096_s18, 1  ;;  %s2096_s18 = sphi %s2130_s18, %s15_s18  }
   0x2   : > { %p187_p1 = scmp.lt.s32.totalorder %s2096_s18, 3 }
   0x4   : > { %p188_p2 = pnand %p1802_p0, %p187_p1 }
   0x5   : > { %p215_p3 = scmp.lt.s32.totalorder (!%p188_p2), %s1798_s19, 1  ;;  %s2098_s24 = smov (!%p188_p2), 4  }
   0x6   : > { %191 = sbr.rel (%p188_p2) target bundleno = 679 (0x2a7), region = 40  ;;  %s2099_s25 = smov (!%p188_p2), 8  }
   0xb   : > { %s2684_s19 = smov (!%p215_p3, %s1798_s19), 1  ;;  %v1902_v25 = vld [vmem:[%s2678_s1] sm:$0xf]  ;;  %v1979_v26 = vld [vmem:[%s2678_s1] sm:$0x30]  ;;  %vm934_vm0 = vcmask 1045504  }
   0xc   : > { %s2077_s20 = smul.u32 216, %s2684_s19  ;;  %v1903_v27 = vor.u32 %v1979_v26, %v1902_v25  ;;  %v1924_v40 = vld [vmem:[%s2678_s1 + $0x10] sm:$0xf]  ;;  %v1981_v41 = vld [vmem:[%s2678_s1 + $0x10] sm:$0x30]  ;;  %vm552_vm1 = vcmask 31744  }
   0xd   : > { %v1925_v42 = vor.u32 %v1981_v41, %v1924_v40  ;;  %v1882_v43 = vld [vmem:[%s2678_s1 + $0x8] sm:$0xf]  ;;  %v1980_v44 = vld [vmem:[%s2678_s1 + $0x8] sm:$0x30]  ;;  %vm649_vm2 = vcmask 64512   ;;  %vm885_vm3 = vcmask 97280  }
   0xe   : > { %s2144_s23 = scalar_lea.vmem %s2677_s0, %s2077_s20  ;;  %v1065_v29 = vsel %vm934_vm0, %v1903_v27, 0  ;;  %v1883_v46 = vor.u32 %v1980_v44, %v1882_v43  ;;  %vm1188_vm4 = vcmask 1046528   ;;  %vm716_vm5 = vsmask.f32 7424  ;;  %s1960_s21 = sshll.u32 %s2684_s19, 7 }
   0xf   : > { %v2147_v0 = vld [vmem:[%s2144_s23 + $0xc] sm:$0xff]  ;;  %v2150_v1 = vld [vmem:[%s2144_s23 + $0x18] sm:$0xff]  ;;  %v231_v2 = vld [vmem:[%s2144_s23 + $0x14] sm:$0x1]  ;;  %1074 = vmatpush.bf16.msra.mxu1 %v1065_v29  ;;  %v1294_v45 = vsel %vm934_vm0, %v1925_v42, 0  ;;  %vm1586_vm6 = vcmask 1043456  }
  0x10   : > { %v234_v3 = vld [vmem:[%s2144_s23 + $0x20] sm:$0x1]  ;;  %416 = vrot.lane.b32.xlu0 %v2147_v0, %s2098_s24  ;;  %488 = vrot.lane.b32.xlu1 %v2150_v1, %s2099_s25  ;;  %v333_v4 = vunpack.c.l.b16 %v231_v2  ;;  %v237_v8 = vld [vmem:[%s2144_s23 + $0x2c] sm:$0x1]  ;;  %v936_v47 = vsel %vm934_vm0, %v1883_v46, 0 }
  0x11   : > { %v336_v5 = vunpack.c.l.b16 %v234_v3  ;;  %420 = vrot.lane.b32.xlu2 %v2150_v1, %s2098_s24  ;;  %v339_v9 = vunpack.c.l.b16 %v237_v8  ;;  %v2172_v10 = vld [vmem:[%s2144_s23 + $0x24] sm:$0xff]  ;;  %v240_v12 = vld [vmem:[%s2144_s23 + $0x38] sm:$0x1]  ;;  %v2184_v14 = vld [vmem:[%s2144_s23 + $0x30] sm:$0xff]  ;;  %1303 = vmatpush.bf16.msra.mxu2 %v1294_v45 }
  0x12   : > { %v2160_v6 = vpack.c.b16 %v333_v4, %v333_v4  ;;  %v342_v13 = vunpack.c.l.b16 %v240_v12  ;;  %v243_v16 = vld [vmem:[%s2144_s23 + $0x44] sm:$0x1]  ;;  %v2196_v17 = vld [vmem:[%s2144_s23 + $0x3c] sm:$0xff]  ;;  %v246_v20 = vld [vmem:[%s2144_s23 + $0x50] sm:$0x1]  ;;  %945 = vmatpush.bf16.msra.mxu0 %v936_v47 }
  0x13   : > { %v2162_v7 = vpack.c.b16 %v336_v5, %v336_v5  ;;  %v2174_v11 = vpack.c.b16 %v339_v9, %v339_v9  ;;  %v345_v18 = vunpack.c.l.b16 %v243_v16  ;;  %v348_v21 = vunpack.c.l.b16 %v246_v20  ;;  %v2214_v22 = vld [vmem:[%s2144_s23 + $0x48] sm:$0xff]  ;;  %v249_v24 = vld [vmem:[%s2144_s23 + $0x5c] sm:$0x1]  ;;  %v2233_v30 = vld [vmem:[%s2144_s23 + $0x54] sm:$0xff] }
  0x14   : > { %v2186_v15 = vpack.c.b16 %v342_v13, %v342_v13  ;;  %v351_v28 = vunpack.c.l.b16 %v249_v24  ;;  %v252_v32 = vld [vmem:[%s2144_s23 + $0x68] sm:$0x1]  ;;  %v2245_v33 = vld [vmem:[%s2144_s23 + $0x60] sm:$0xff]  ;;  %v255_v36 = vld [vmem:[%s2144_s23 + $0x74] sm:$0x1] }
  0x15   : > { %v2204_v19 = vpack.c.b16 %v345_v18, %v345_v18  ;;  %v2216_v23 = vpack.c.b16 %v348_v21, %v348_v21  ;;  %v354_v34 = vunpack.c.l.b16 %v252_v32  ;;  %v357_v37 = vunpack.c.l.b16 %v255_v36  ;;  %v2263_v38 = vld [vmem:[%s2144_s23 + $0x6c] sm:$0xff]  ;;  %v2290_v48 = vld [vmem:[%s2144_s23 + $0x78] sm:$0xff]  ;;  %v258_v49 = vld [vmem:[%s2144_s23 + $0x80] sm:$0x1] }
  0x16   : > { %v2235_v31 = vpack.c.b16 %v351_v28, %v351_v28  ;;  %v360_v50 = vunpack.c.l.b16 %v258_v49  ;;  %v261_v51 = vld [vmem:[%s2144_s23 + $0x8c] sm:$0x1]  ;;  %v1961_v53 = vld [vmem:[%s2144_s23] sm:$0xff]  ;;  %v228_v55 = vld [vmem:[%s2144_s23 + $0x8] sm:$0x1] }
  0x17   : > { %v2253_v35 = vpack.c.b16 %v354_v34, %v354_v34  ;;  %v2265_v39 = vpack.c.b16 %v357_v37, %v357_v37  ;;  %v363_v52 = vunpack.c.l.b16 %v261_v51  ;;  %v330_v60 = vunpack.c.l.b16 %v228_v55  ;;  %v2314_v62 = vld [vmem:[%s2144_s23 + $0x84] sm:$0xff]  ;;  %v2317_v2 = vld [vmem:[%s2144_s23 + $0x90] sm:$0xff]  ;;  %v264_v24 = vld [vmem:[%s2144_s23 + $0x98] sm:$0x1] }
  0x18   : > { %418 = vrot.lane.b32.xlu0 %v2160_v6, %s2098_s24  ;;  %490 = vrot.lane.b32.xlu1 %v2162_v7, %s2099_s25  ;;  %v2299_v54 = vpack.c.b16 %v360_v50, %v360_v50  ;;  %v366_v25 = vunpack.c.l.b16 %v264_v24  ;;  %v2348_v44 = vld [vmem:[%s2144_s23 + $0x9c] sm:$0xff]  ;;  %v270_v24 = vld [vmem:[%s2144_s23 + $0xb0] sm:$0x1] }
  0x19   : > { %422 = vrot.lane.b32.xlu2 %v2162_v7, %s2098_s24  ;;  %v2302_v56 = vpack.c.b16 %v363_v52, %v363_v52  ;;  %v377_v4 = vpack.c.b16 %v330_v60, %v330_v60 }
  0x1a   : > { %v2332_v34 = vpack.c.b16 %v366_v25, %v366_v25  ;;  %v372_v25 = vunpack.c.l.b16 %v270_v24 }
  0x20   : > { %492 = vrot.lane.b32.xlu0 %v2172_v10, %s2099_s25  ;;  %494 = vrot.lane.b32.xlu1 %v2174_v11, %s2099_s25 }
  0x21   : > { %424 = vrot.lane.b32.xlu2 %v2172_v10, %s2098_s24 }
  0x28   : > { %496 = vrot.lane.b32.xlu1 %v2184_v14, %s2099_s25  ;;  %426 = vrot.lane.b32.xlu0 %v2174_v11, %s2098_s24 }
  0x29   : > { %498 = vrot.lane.b32.xlu2 %v2186_v15, %s2099_s25 }
  0x30   : > { %428 = vrot.lane.b32.xlu0 %v2184_v14, %s2098_s24  ;;  %430 = vrot.lane.b32.xlu1 %v2186_v15, %s2098_s24 }
  0x31   : > { %500 = vrot.lane.b32.xlu2 %v2196_v17, %s2099_s25 }
  0x38   : > { %502 = vrot.lane.b32.xlu0 %v2204_v19, %s2099_s25  ;;  %432 = vrot.lane.b32.xlu1 %v2196_v17, %s2098_s24 }
  0x39   : > { %434 = vrot.lane.b32.xlu2 %v2204_v19, %s2098_s24 }
  0x40   : > { %504 = vrot.lane.b32.xlu0 %v2214_v22, %s2099_s25  ;;  %506 = vrot.lane.b32.xlu1 %v2216_v23, %s2099_s25 }
  0x41   : > { %436 = vrot.lane.b32.xlu2 %v2214_v22, %s2098_s24 }
  0x48   : > { %508 = vrot.lane.b32.xlu1 %v2233_v30, %s2099_s25  ;;  %438 = vrot.lane.b32.xlu0 %v2216_v23, %s2098_s24 }
  0x49   : > { %510 = vrot.lane.b32.xlu2 %v2235_v31, %s2099_s25 }
  0x50   : > { %440 = vrot.lane.b32.xlu0 %v2233_v30, %s2098_s24  ;;  %442 = vrot.lane.b32.xlu1 %v2235_v31, %s2098_s24 }
  0x51   : > { %512 = vrot.lane.b32.xlu2 %v2245_v33, %s2099_s25 }
  0x58   : > { %514 = vrot.lane.b32.xlu0 %v2253_v35, %s2099_s25  ;;  %444 = vrot.lane.b32.xlu1 %v2245_v33, %s2098_s24 }
  0x59   : > { %446 = vrot.lane.b32.xlu2 %v2253_v35, %s2098_s24 }
  0x60   : > { %516 = vrot.lane.b32.xlu0 %v2263_v38, %s2099_s25  ;;  %518 = vrot.lane.b32.xlu1 %v2265_v39, %s2099_s25 }
  0x61   : > { %448 = vrot.lane.b32.xlu2 %v2263_v38, %s2098_s24 }
  0x68   : > { %450 = vrot.lane.b32.xlu0 %v2265_v39, %s2098_s24  ;;  %520 = vrot.lane.b32.xlu1 %v2290_v48, %s2099_s25 }
  0x69   : > { %522 = vrot.lane.b32.xlu2 %v2299_v54, %s2099_s25 }
  0x6b   : > { %v421_v63 = vpop.permute.xlu2 %420 }
  0x6c   : > { %v561_v29 = vsel %vm552_vm1, %v2147_v0, %v421_v63 }
  0x70   : > { %452 = vrot.lane.b32.xlu0 %v2290_v48, %s2098_s24  ;;  %454 = vrot.lane.b32.xlu1 %v2299_v54, %s2098_s24 }
  0x71   : > { %524 = vrot.lane.b32.xlu2 %v2314_v62, %s2099_s25 }
  0x73   : > { %v423_v32 = vpop.permute.xlu2 %422 }
  0x74   : > { %v564_v0 = vsel %vm552_vm1, %v2160_v6, %v423_v32  ;;  %v2375_v32 = vpack.c.b16 %v372_v25, %v372_v25 }
  0x78   : > { %526 = vrot.lane.b32.xlu0 %v2302_v56, %s2099_s25  ;;  %456 = vrot.lane.b32.xlu1 %v2314_v62, %s2098_s24 }
  0x79   : > { %458 = vrot.lane.b32.xlu2 %v2302_v56, %s2098_s24 }
  0x7b   : > { %v425_v49 = vpop.permute.xlu2 %424 }
  0x80   : > { %528 = vrot.lane.b32.xlu0 %v2317_v2, %s2099_s25  ;;  %530 = vrot.lane.b32.xlu1 %v2332_v34, %s2099_s25 }
  0x81   : > { %460 = vrot.lane.b32.xlu2 %v2317_v2, %s2098_s24 }
  0x82   : > { %v417_v57 = vpop.permute.xlu0 %416  ;;  %v489_v58 = vpop.permute.xlu1 %488 }
  0x83   : > { %v555_v59 = vsel %vm552_vm1, %v1961_v53, %v417_v57  ;;  %v567_v53 = vsel %vm552_vm1, %v2150_v1, %v425_v49  ;;  %v499_v63 = vpop.permute.xlu2 %498 }
  0x84   : > { %v651_v61 = vsel %vm649_vm2, %v555_v59, %v489_v58 }
  0x85   : > { %1904 = vmatmul.msk.bf16.vlgmr.msra.gmra.mxu1 %vm885_vm3, %v651_v61  ;;  %v719_v3 = vshll.u32 %v651_v61, 16  ;;  %v717_v16 = vshrl.u32 %v651_v61, 16  ;;  %v1189_v18 = vrot.slane %v651_v61, 1 }
  0x87   : > { %v721_v9 = vrot.slane %v719_v3, 1 }
  0x88   : > { %462 = vrot.lane.b32.xlu0 %v2332_v34, %s2098_s24  ;;  %532 = vrot.lane.b32.xlu1 %v2348_v44, %s2099_s25 }
  0x89   : > { %v722_v28 = vor.u32 %v721_v9, %v717_v16  ;;  %v267_v16 = vld [vmem:[%s2144_s23 + $0xa4] sm:$0x1] }
  0x8a   : > { %v419_v5 = vpop.permute.xlu0 %418  ;;  %v491_v8 = vpop.permute.xlu1 %490 }
  0x8b   : > { %v558_v12 = vsel %vm552_vm1, %v377_v4, %v419_v5 }
  0x8c   : > { %v653_v13 = vsel %vm649_vm2, %v558_v12, %v491_v8 }
  0x8d   : > { %v723_v20 = vshll.u32 %v653_v13, 16  ;;  %v1190_v21 = vrot.slane %v653_v13, 1 }
  0x8f   : > { %v725_v26 = vrot.slane %v723_v20, 1  ;;  %v1191_v27 = vsel %vm1188_vm4, %v1189_v18, %v1190_v21  ;;  %v369_v21 = vunpack.c.l.b16 %v267_v16 }
  0x90   : > { %1926 = vmatmul.msk.bf16.vlgmr.msra.gmra.mxu2 %vm885_vm3, %v1191_v27  ;;  %464 = vrot.lane.b32.xlu0 %v2348_v44, %s2098_s24  ;;  %v501_v27 = vpop.permute.xlu2 %500 }
  0x91   : > { %v726_v36 = vsel %vm716_vm5, %v722_v28, %v725_v26 }
  0x92   : > { %v493_v37 = vpop.permute.xlu0 %492  ;;  %1884 = vmatmul.msk.bf16.vlgmr.msra.gmra.mxu0 %vm885_vm3, %v726_v36  ;;  %v495_v41 = vpop.permute.xlu1 %494 }
  0x93   : > { %v655_v40 = vsel %vm649_vm2, %v561_v29, %v493_v37  ;;  %v657_v43 = vsel %vm649_vm2, %v564_v0, %v495_v41  ;;  %v2372_v29 = vpack.c.b16 %v369_v21, %v369_v21  ;;  %v2390_v41 = vld [vmem:[%s2144_s23 + $0xa8] sm:$0xff] }
  0x94   : > { %v729_v42 = vshll.u32 %v655_v40, 16  ;;  %v727_v45 = vshrl.u32 %v655_v40, 16  ;;  %v733_v47 = vshll.u32 %v657_v43, 16  ;;  %v1192_v6 = vrot.slane %v655_v40, 1 }
  0x95   : > { %1905 = vmatmul.msk.bf16.gmra.mxu1 %vm885_vm3, %v655_v40  ;;  %v1193_v50 = vrot.slane %v657_v43, 1  ;;  %466 = vrot.lane.b32.xlu1 %v2372_v29, %s2098_s24  ;;  %v2394_v43 = vld [vmem:[%s2144_s23 + $0xb4] sm:$0xff] }
  0x96   : > { %v731_v46 = vrot.slane %v729_v42, 1  ;;  %v735_v51 = vrot.slane %v733_v47, 1  ;;  %534 = vrot.lane.b32.xlu2 %v2372_v29, %s2099_s25 }
  0x97   : > { %v1194_v55 = vsel %vm1188_vm4, %v1192_v6, %v1193_v50 }
  0x98   : > { %v732_v52 = vor.u32 %v731_v46, %v727_v45  ;;  %538 = vrot.lane.b32.xlu0 %v2375_v32, %s2099_s25 }
  0x9a   : > { %v497_v57 = vpop.permute.xlu1 %496  ;;  %v427_v58 = vpop.permute.xlu0 %426  ;;  %v736_v59 = vsel %vm716_vm5, %v732_v52, %v735_v51  ;;  %v273_v52 = vld [vmem:[%s2144_s23 + $0xbc] sm:$0x1] }
  0x9b   : > { %v659_v60 = vsel %vm649_vm2, %v567_v53, %v497_v57  ;;  %v570_v61 = vsel %vm552_vm1, %v2162_v7, %v427_v58  ;;  %v375_v53 = vunpack.c.l.b16 %v273_v52 }
  0x9c   : > { %v739_v3 = vshll.u32 %v659_v60, 16  ;;  %v661_v1 = vsel %vm649_vm2, %v570_v61, %v499_v63  ;;  %v737_v4 = vshrl.u32 %v659_v60, 16  ;;  %v1195_v12 = vrot.slane %v659_v60, 1 }
  0x9d   : > { %v743_v8 = vshll.u32 %v661_v1, 16  ;;  %v1196_v13 = vrot.slane %v661_v1, 1  ;;  %468 = vrot.lane.b32.xlu1 %v2390_v41, %s2098_s24 }
  0x9e   : > { %v741_v5 = vrot.slane %v739_v3, 1  ;;  %536 = vrot.lane.b32.xlu2 %v2390_v41, %s2099_s25 }
  0x9f   : > { %v745_v18 = vrot.slane %v743_v8, 1  ;;  %v1197_v26 = vsel %vm1188_vm4, %v1195_v12, %v1196_v13 }
  0xa0   : > { %1927 = vmatmul.msk.bf16.gmra.mxu2 %vm885_vm3, %v1194_v55  ;;  %v742_v20 = vor.u32 %v741_v5, %v737_v4  ;;  %540 = vrot.lane.b32.xlu0 %v2394_v43, %s2099_s25  ;;  %v1977_v5 = vld [vmem:[%s2144_s23 + $0xc0] sm:$0xff] }
  0xa2   : > { %1885 = vmatmul.msk.bf16.gmra.mxu0 %vm885_vm3, %v736_v59  ;;  %v429_v9 = vpop.permute.xlu0 %428  ;;  %v431_v28 = vpop.permute.xlu1 %430  ;;  %v746_v36 = vsel %vm716_vm5, %v742_v20, %v745_v18 }
  0xa3   : > { %v573_v7 = vsel %vm552_vm1, %v2172_v10, %v429_v9  ;;  %v576_v37 = vsel %vm552_vm1, %v2174_v11, %v431_v28  ;;  %v435_v59 = vpop.permute.xlu2 %434 }
  0xa4   : > { %v663_v10 = vsel %vm649_vm2, %v573_v7, %v501_v27 }
  0xa5   : > { %1906 = vmatmul.msk.bf16.gmra.mxu1 %vm885_vm3, %v659_v60  ;;  %v749_v40 = vshll.u32 %v663_v10, 16  ;;  %v747_v45 = vshrl.u32 %v663_v10, 16  ;;  %v1198_v11 = vrot.slane %v663_v10, 1  ;;  %v2407_v60 = vpack.c.b16 %v375_v53, %v375_v53 }
  0xa6   : > { %470 = vrot.lane.b32.xlu2 %v2375_v32, %s2098_s24 }
  0xa7   : > { %v751_v46 = vrot.slane %v749_v40, 1  ;;  %542 = vrot.lane.b32.xlu1 %v2407_v60, %s2099_s25 }
  0xa8   : > { %474 = vrot.lane.b32.xlu0 %v2407_v60, %s2098_s24 }
  0xa9   : > { %v752_v51 = vor.u32 %v751_v46, %v747_v45 }
  0xaa   : > { %v503_v0 = vpop.permute.xlu0 %502  ;;  %v433_v49 = vpop.permute.xlu1 %432 }
  0xab   : > { %v665_v42 = vsel %vm649_vm2, %v576_v37, %v503_v0  ;;  %v579_v55 = vsel %vm552_vm1, %v2184_v14, %v433_v49  ;;  %v582_v14 = vsel %vm552_vm1, %v2186_v15, %v435_v59  ;;  %v437_v13 = vpop.permute.xlu2 %436 }
  0xac   : > { %v753_v47 = vshll.u32 %v665_v42, 16  ;;  %v1199_v6 = vrot.slane %v665_v42, 1  ;;  %v585_v21 = vsel %vm552_vm1, %v2196_v17, %v437_v13 }
  0xae   : > { %v755_v50 = vrot.slane %v753_v47, 1  ;;  %v1200_v57 = vsel %vm1188_vm4, %v1198_v11, %v1199_v6  ;;  %472 = vrot.lane.b32.xlu2 %v2394_v43, %s2098_s24  ;;  %v276_v47 = vld [vmem:[%s2144_s23 + $0xc8] sm:$0x1] }
  0xaf   : > { %544 = vrot.lane.b32.xlu1 %v1977_v5, %s2099_s25  ;;  %v413_v6 = vunpack.c.l.b16 %v276_v47 }
  0xb0   : > { %1928 = vmatmul.msk.bf16.gmra.mxu2 %vm885_vm3, %v1197_v26  ;;  %v756_v61 = vsel %vm716_vm5, %v752_v51, %v755_v50  ;;  %476 = vrot.lane.b32.xlu0 %v1977_v5, %s2098_s24  ;;  %v279_v50 = vld [vmem:[%s2144_s23 + $0xd4] sm:$0x1] }
  0xb1   : > { %v485_v51 = vunpack.c.l.b16 %v279_v50 }
  0xb2   : > { %1886 = vmatmul.msk.bf16.gmra.mxu0 %vm885_vm3, %v746_v36  ;;  %v505_v58 = vpop.permute.xlu0 %504  ;;  %v507_v3 = vpop.permute.xlu1 %506 }
  0xb3   : > { %v667_v63 = vsel %vm649_vm2, %v579_v55, %v505_v58  ;;  %v669_v4 = vsel %vm649_vm2, %v582_v14, %v507_v3  ;;  %v511_v36 = vpop.permute.xlu2 %510  ;;  %v487_v58 = vpack.c.b16 %v485_v51, %v485_v51 }
  0xb4   : > { %v759_v1 = vshll.u32 %v667_v63, 16  ;;  %v757_v8 = vshrl.u32 %v667_v63, 16  ;;  %v763_v12 = vshll.u32 %v669_v4, 16  ;;  %v1201_v15 = vrot.slane %v667_v63, 1 }
  0xb5   : > { %1907 = vmatmul.msk.bf16.gmra.mxu1 %vm885_vm3, %v663_v10  ;;  %v1202_v16 = vrot.slane %v669_v4, 1 }
  0xb6   : > { %v761_v9 = vrot.slane %v759_v1, 1  ;;  %v765_v18 = vrot.slane %v763_v12, 1 }
  0xb7   : > { %v1203_v24 = vsel %vm1188_vm4, %v1201_v15, %v1202_v16 }
  0xb8   : > { %v762_v20 = vor.u32 %v761_v9, %v757_v8  ;;  %550 = vrot.lane.b32.xlu0 %v487_v58, %s2099_s25 }
  0xba   : > { %v509_v25 = vpop.permute.xlu1 %508  ;;  %v439_v7 = vpop.permute.xlu0 %438  ;;  %v766_v26 = vsel %vm716_vm5, %v762_v20, %v765_v18 }
  0xbb   : > { %v671_v27 = vsel %vm649_vm2, %v585_v21, %v509_v25  ;;  %v588_v28 = vsel %vm552_vm1, %v2204_v19, %v439_v7  ;;  %v513_v53 = vpop.permute.xlu2 %512 }
  0xbc   : > { %v769_v10 = vshll.u32 %v671_v27, 16  ;;  %v673_v17 = vsel %vm649_vm2, %v588_v28, %v511_v36  ;;  %v767_v37 = vshrl.u32 %v671_v27, 16  ;;  %v1204_v45 = vrot.slane %v671_v27, 1 }
  0xbd   : > { %v773_v40 = vshll.u32 %v673_v17, 16  ;;  %v1205_v46 = vrot.slane %v673_v17, 1 }
  0xbe   : > { %v771_v0 = vrot.slane %v769_v10, 1 }
  0xbf   : > { %v775_v49 = vrot.slane %v773_v40, 1  ;;  %v1206_v52 = vsel %vm1188_vm4, %v1204_v45, %v1205_v46 }
  0xc0   : > { %1929 = vmatmul.msk.bf16.gmra.mxu2 %vm885_vm3, %v1200_v57  ;;  %v772_v11 = vor.u32 %v771_v0, %v767_v37  ;;  %v415_v57 = vpack.c.b16 %v413_v6, %v413_v6 }
  0xc2   : > { %1887 = vmatmul.msk.bf16.gmra.mxu0 %vm885_vm3, %v756_v61  ;;  %v441_v42 = vpop.permute.xlu0 %440  ;;  %v443_v55 = vpop.permute.xlu1 %442  ;;  %v776_v59 = vsel %vm716_vm5, %v772_v11, %v775_v49  ;;  %478 = vrot.lane.b32.xlu1 %v415_v57, %s2098_s24  ;;  %v1533_v11 = vld [vmem:[%s2680_s3] sm:$0xf]  ;;  %s2607_s24 = scalar_lea.vmem %s2682_s5, %s1960_s21 }
  0xc3   : > { %v591_v19 = vsel %vm552_vm1, %v2214_v22, %v441_v42  ;;  %546 = vrot.lane.b32.xlu2 %v415_v57, %s2099_s25  ;;  %v594_v22 = vsel %vm552_vm1, %v2216_v23, %v443_v55  ;;  %v447_v20 = vpop.permute.xlu2 %446  ;;  %v1588_v51 = vsel %vm1586_vm6, %v1533_v11, 0 }
  0xc4   : > { %v675_v61 = vsel %vm649_vm2, %v591_v19, %v513_v53  ;;  %v600_v25 = vsel %vm552_vm1, %v2235_v31, %v447_v20  ;;  %1597 = vmatpush.bf16.msra.mxu3 %v1588_v51 }
  0xc5   : > { %1908 = vmatmul.msk.bf16.gmra.mxu1 %vm885_vm3, %v667_v63  ;;  %v779_v14 = vshll.u32 %v675_v61, 16  ;;  %v777_v1 = vshrl.u32 %v675_v61, 16  ;;  %v1207_v9 = vrot.slane %v675_v61, 1 }
  0xc7   : > { %v781_v4 = vrot.slane %v779_v14, 1 }
  0xc9   : > { %v782_v15 = vor.u32 %v781_v4, %v777_v1 }
  0xca   : > { %v515_v63 = vpop.permute.xlu0 %514  ;;  %v445_v8 = vpop.permute.xlu1 %444 }
  0xcb   : > { %v677_v3 = vsel %vm649_vm2, %v594_v22, %v515_v63  ;;  %v597_v16 = vsel %vm552_vm1, %v2233_v30, %v445_v8  ;;  %v449_v17 = vpop.permute.xlu2 %448 }
  0xcc   : > { %v783_v5 = vshll.u32 %v677_v3, 16  ;;  %v1208_v12 = vrot.slane %v677_v3, 1  ;;  %v603_v31 = vsel %vm552_vm1, %v2245_v33, %v449_v17 }
  0xce   : > { %v785_v13 = vrot.slane %v783_v5, 1  ;;  %v1209_v23 = vsel %vm1188_vm4, %v1207_v9, %v1208_v12 }
  0xd0   : > { %1930 = vmatmul.msk.bf16.gmra.mxu2 %vm885_vm3, %v1203_v24  ;;  %v786_v21 = vsel %vm716_vm5, %v782_v15, %v785_v13 }
  0xd2   : > { %1888 = vmatmul.msk.bf16.gmra.mxu0 %vm885_vm3, %v766_v26  ;;  %v517_v18 = vpop.permute.xlu0 %516  ;;  %v519_v7 = vpop.permute.xlu1 %518 }
  0xd3   : > { %v679_v24 = vsel %vm649_vm2, %v597_v16, %v517_v18  ;;  %v681_v30 = vsel %vm649_vm2, %v600_v25, %v519_v7  ;;  %v523_v19 = vpop.permute.xlu2 %522 }
  0xd4   : > { %v789_v26 = vshll.u32 %v679_v24, 16  ;;  %v787_v28 = vshrl.u32 %v679_v24, 16  ;;  %v793_v10 = vshll.u32 %v681_v30, 16  ;;  %v1210_v37 = vrot.slane %v679_v24, 1 }
  0xd5   : > { %1909 = vmatmul.msk.bf16.gmra.mxu1 %vm885_vm3, %v671_v27  ;;  %v1978_v27 = vld [vmem:[%s2144_s23 + $0xcc] sm:$0xff]  ;;  %v1211_v0 = vrot.slane %v681_v30, 1 }
  0xd6   : > { %548 = vrot.lane.b32.xlu2 %v1978_v27, %s2099_s25  ;;  %v791_v36 = vrot.slane %v789_v26, 1  ;;  %v795_v40 = vrot.slane %v793_v10, 1 }
  0xd7   : > { %v1212_v45 = vsel %vm1188_vm4, %v1210_v37, %v1211_v0 }
  0xd8   : > { %v792_v42 = vor.u32 %v791_v36, %v787_v28 }
  0xda   : > { %v521_v46 = vpop.permute.xlu1 %520  ;;  %v451_v47 = vpop.permute.xlu0 %450  ;;  %v796_v49 = vsel %vm716_vm5, %v792_v42, %v795_v40 }
  0xdb   : > { %v683_v6 = vsel %vm649_vm2, %v603_v31, %v521_v46  ;;  %v606_v33 = vsel %vm552_vm1, %v2253_v35, %v451_v47  ;;  %v525_v1 = vpop.permute.xlu2 %524 }
  0xdc   : > { %v685_v53 = vsel %vm649_vm2, %v606_v33, %v523_v19  ;;  %v797_v55 = vshrl.u32 %v683_v6, 16  ;;  %v1213_v22 = vrot.slane %v683_v6, 1 }
  0xdd   : > { %v803_v58 = vshll.u32 %v685_v53, 16  ;;  %v1214_v63 = vrot.slane %v685_v53, 1 }
  0xdf   : > { %v805_v14 = vrot.slane %v803_v58, 1  ;;  %v1215_v5 = vsel %vm1188_vm4, %v1213_v22, %v1214_v63 }
  0xe0   : > { %1931 = vmatmul.msk.bf16.gmra.mxu2 %vm885_vm3, %v1206_v52  ;;  %v799_v52 = vshll.u32 %v683_v6, 16 }
  0xe2   : > { %1889 = vmatmul.msk.bf16.gmra.mxu0 %vm885_vm3, %v776_v59  ;;  %v801_v57 = vrot.slane %v799_v52, 1  ;;  %v453_v59 = vpop.permute.xlu0 %452  ;;  %v455_v8 = vpop.permute.xlu1 %454 }
  0xe3   : > { %v609_v35 = vsel %vm552_vm1, %v2263_v38, %v453_v59  ;;  %v612_v15 = vsel %vm552_vm1, %v2265_v39, %v455_v8 }
  0xe4   : > { %v802_v3 = vor.u32 %v801_v57, %v797_v55  ;;  %v687_v12 = vsel %vm649_vm2, %v609_v35, %v525_v1 }
  0xe5   : > { %1910 = vmatmul.msk.bf16.gmra.mxu1 %vm885_vm3, %v675_v61  ;;  %v809_v38 = vshll.u32 %v687_v12, 16  ;;  %v807_v7 = vshrl.u32 %v687_v12, 16  ;;  %v1216_v10 = vrot.slane %v687_v12, 1 }
  0xe6   : > { %v806_v9 = vsel %vm716_vm5, %v802_v3, %v805_v14 }
  0xe7   : > { %v811_v26 = vrot.slane %v809_v38, 1 }
  0xe9   : > { %v812_v42 = vor.u32 %v811_v26, %v807_v7 }
  0xea   : > { %v457_v27 = vpop.permute.xlu1 %456 }
  0xeb   : > { %v615_v47 = vsel %vm552_vm1, %v2290_v48, %v457_v27 }
  0xf0   : > { %1932 = vmatmul.msk.bf16.gmra.mxu2 %vm885_vm3, %v1209_v23  ;;  %v527_v23 = vpop.permute.xlu0 %526 }
  0xf2   : > { %1890 = vmatmul.msk.bf16.gmra.mxu0 %vm885_vm3, %v786_v21  ;;  %v2494_v21 = vld [vmem:[%s2679_s2] ss:$0 sm:$0xff]  ;;  %v531_v57 = vpop.permute.xlu1 %530 }
  0xf5   : > { %1911 = vmatmul.msk.bf16.gmra.mxu1 %vm885_vm3, %v679_v24  ;;  %v689_v24 = vsel %vm649_vm2, %v612_v15, %v527_v23 }
  0xf6   : > { %v813_v30 = vshll.u32 %v689_v24, 16  ;;  %v1217_v17 = vrot.slane %v689_v24, 1 }
  0xf8   : > { %v815_v40 = vrot.slane %v813_v30, 1  ;;  %v529_v46 = vpop.permute.xlu0 %528  ;;  %v1218_v11 = vsel %vm1188_vm4, %v1216_v10, %v1217_v17 }
  0xf9   : > { %v691_v52 = vsel %vm649_vm2, %v615_v47, %v529_v46 }
  0xfa   : > { %v816_v51 = vsel %vm716_vm5, %v812_v42, %v815_v40  ;;  %v817_v3 = vshrl.u32 %v691_v52, 16 }
 0x100   : > { %1933 = vmatmul.msk.bf16.gmra.mxu2 %vm885_vm3, %v1212_v45  ;;  %v463_v26 = vpop.permute.xlu0 %462 }
 0x101   : > { %v624_v17 = vsel %vm552_vm1, %v2302_v56, %v463_v26 }
 0x102   : > { %1891 = vmatmul.msk.bf16.gmra.mxu0 %vm885_vm3, %v796_v49  ;;  %v1076_v50 = vpop.f32.mrf.mxu1 }
 0x105   : > { %1912 = vmatmul.msk.bf16.gmra.mxu1 %vm885_vm3, %v683_v6  ;;  %v459_v6 = vpop.permute.xlu2 %458 }
 0x106   : > { %v618_v55 = vsel %vm552_vm1, %v2299_v54, %v459_v6 }
 0x107   : > { %v693_v63 = vsel %vm649_vm2, %v618_v55, %v531_v57 }
 0x108   : > { %v823_v35 = vshll.u32 %v693_v63, 16  ;;  %v465_v6 = vpop.permute.xlu0 %464 }
 0x10a   : > { %v1078_v61 = vpop.f32.mrf.mxu1 }
 0x10f   : > { %v947_v4 = vpop.f32.mrf.mxu0 }
 0x110   : > { %1934 = vmatmul.msk.bf16.gmra.mxu2 %vm885_vm3, %v1215_v5  ;;  %v1077_v18 = vadd.f32 %v1076_v50, %v947_v4  ;;  %v461_v4 = vpop.permute.xlu2 %460 }
 0x111   : > { %v621_v24 = vsel %vm552_vm1, %v2314_v62, %v461_v4 }
 0x112   : > { %1892 = vmatmul.msk.bf16.gmra.mxu0 %vm885_vm3, %v806_v9  ;;  %v1081_v13 = vpop.f32.mrf.mxu1  ;;  %v1219_v9 = vrot.slane %v691_v52, 1 }
 0x113   : > { %v1305_v16 = vpop.f32.mrf.mxu2 }
 0x114   : > { %v1385_v20 = vadd.f32 %v1305_v16, %v1077_v18  ;;  %v825_v16 = vrot.slane %v823_v35, 1 }
 0x115   : > { %1913 = vmatmul.msk.bf16.gmra.mxu1 %vm885_vm3, %v687_v12  ;;  %v1220_v12 = vrot.slane %v693_v63, 1 }
 0x116   : > { %v1421_v39 = vadd.f32 %v2494_v21, %v1385_v20  ;;  %v533_v20 = vpop.permute.xlu1 %532 }
 0x117   : > { %v949_v25 = vpop.f32.mrf.mxu0  ;;  %v1221_v7 = vsel %vm1188_vm4, %v1219_v9, %v1220_v12  ;;  %v539_v9 = vpop.permute.xlu0 %538 }
 0x118   : > { %v1079_v28 = vadd.f32 %v1078_v61, %v949_v25  ;;  %v1453_v31 = vmul.f32 0.1, %v1421_v39  ;;  %v819_v61 = vshll.u32 %v691_v52, 16 }
 0x11a   : > { %v1083_v36 = vpop.f32.mrf.mxu1  ;;  %v1485_v33 = vmax.f32 %v1421_v39, %v1453_v31  ;;  %v821_v1 = vrot.slane %v819_v61, 1  ;;  %v627_v61 = vsel %vm552_vm1, %v2317_v2, %v465_v6 }
 0x11b   : > { %v1307_v37 = vpop.f32.mrf.mxu2 }
 0x11c   : > { %v1386_v0 = vadd.f32 %v1307_v37, %v1079_v28  ;;  %v822_v23 = vor.u32 %v821_v1, %v817_v3  ;;  %v535_v37 = vpop.permute.xlu2 %534 }
 0x11e   : > { %v1422_v45 = vadd.f32 %v2494_v21, %v1386_v0  ;;  %v826_v27 = vsel %vm716_vm5, %v822_v23, %v825_v16 }
 0x11f   : > { %v952_v49 = vpop.f32.mrf.mxu0 }
 0x120   : > { %v1454_v50 = vmul.f32 0.1, %v1422_v45  ;;  %1935 = vmatmul.msk.bf16.gmra.mxu2 %vm885_vm3, %v1218_v11  ;;  %v1082_v58 = vadd.f32 %v1081_v13, %v952_v49 }
 0x122   : > { %v1486_v19 = vmax.f32 %v1422_v45, %v1454_v50  ;;  %1893 = vmatmul.msk.bf16.gmra.mxu0 %vm885_vm3, %v816_v51  ;;  %v1086_v53 = vpop.f32.mrf.mxu1  ;;  %v697_v45 = vsel %vm649_vm2, %v624_v17, %v535_v37  ;;  %v541_v37 = vpop.permute.xlu0 %540 }
 0x123   : > { %v1310_v48 = vpop.f32.mrf.mxu2  ;;  %v833_v11 = vshll.u32 %v697_v45, 16 }
 0x124   : > { %v1517_v59 = vpack.c.bf16 %v1486_v19, %v1485_v33  ;;  %v1387_v22 = vadd.f32 %v1310_v48, %v1082_v58  ;;  %v1223_v19 = vrot.slane %v697_v45, 1 }
 0x125   : > { %1914 = vmatmul.msk.bf16.gmra.mxu1 %vm885_vm3, %v691_v52  ;;  %v835_v55 = vrot.slane %v833_v11, 1 }
 0x126   : > { %1942 = vmatmul.msk.bf16.vlgmr.msra.gmra.mxu3 %vm649_vm2, %v1517_v59  ;;  %v1423_v5 = vadd.f32 %v2494_v21, %v1387_v22  ;;  %v537_v59 = vpop.permute.xlu2 %536 }
 0x127   : > { %v954_v14 = vpop.f32.mrf.mxu0 }
 0x128   : > { %v1084_v54 = vadd.f32 %v1083_v36, %v954_v14  ;;  %v1455_v18 = vmul.f32 0.1, %v1423_v5  ;;  %v695_v36 = vsel %vm649_vm2, %v621_v24, %v533_v20  ;;  %v467_v14 = vpop.permute.xlu1 %466 }
 0x129   : > { %v829_v42 = vshll.u32 %v695_v36, 16  ;;  %v827_v47 = vshrl.u32 %v695_v36, 16  ;;  %v1222_v33 = vrot.slane %v695_v36, 1 }
 0x12a   : > { %v1088_v8 = vpop.f32.mrf.mxu1  ;;  %v1487_v39 = vmax.f32 %v1423_v5, %v1455_v18  ;;  %v699_v5 = vsel %vm649_vm2, %v627_v61, %v537_v59 }
 0x12b   : > { %v1312_v13 = vpop.f32.mrf.mxu2  ;;  %v831_v49 = vrot.slane %v829_v42, 1  ;;  %v1224_v63 = vsel %vm1188_vm4, %v1222_v33, %v1223_v19 }
 0x12c   : > { %v1388_v15 = vadd.f32 %v1312_v13, %v1084_v54 }
 0x12d   : > { %v832_v48 = vor.u32 %v831_v49, %v827_v47 }
 0x12e   : > { %v1424_v38 = vadd.f32 %v2494_v21, %v1388_v15  ;;  %v839_v15 = vshll.u32 %v699_v5, 16 }
 0x12f   : > { %v957_v25 = vpop.f32.mrf.mxu0  ;;  %v836_v1 = vsel %vm716_vm5, %v832_v48, %v835_v55 }
 0x130   : > { %v1456_v30 = vmul.f32 0.1, %v1424_v38  ;;  %1936 = vmatmul.msk.bf16.gmra.mxu2 %vm885_vm3, %v1221_v7  ;;  %v1087_v0 = vadd.f32 %v1086_v53, %v957_v25  ;;  %v841_v20 = vrot.slane %v839_v15, 1  ;;  %v469_v25 = vpop.permute.xlu1 %468 }
 0x132   : > { %v1488_v28 = vmax.f32 %v1424_v38, %v1456_v30  ;;  %1894 = vmatmul.msk.bf16.gmra.mxu0 %vm885_vm3, %v826_v27  ;;  %v1091_v10 = vpop.f32.mrf.mxu1  ;;  %v837_v38 = vshrl.u32 %v699_v5, 16  ;;  %v1225_v30 = vrot.slane %v699_v5, 1 }
 0x133   : > { %v1315_v62 = vpop.f32.mrf.mxu2 }
 0x134   : > { %v1518_v40 = vpack.c.bf16 %v1488_v28, %v1487_v39  ;;  %v1389_v31 = vadd.f32 %v1315_v62, %v1087_v0  ;;  %v633_v0 = vsel %vm552_vm1, %v2348_v44, %v469_v25 }
 0x135   : > { %1915 = vmatmul.msk.bf16.gmra.mxu1 %vm885_vm3, %v695_v36  ;;  %v842_v36 = vor.u32 %v841_v20, %v837_v38  ;;  %v703_v11 = vsel %vm649_vm2, %v633_v0, %v541_v37 }
 0x136   : > { %1943 = vmatmul.msk.bf16.gmra.mxu3 %vm649_vm2, %v1518_v40  ;;  %v1425_v50 = vadd.f32 %v2494_v21, %v1389_v31  ;;  %v471_v31 = vpop.permute.xlu2 %470  ;;  %v849_v19 = vshll.u32 %v703_v11, 16  ;;  %v847_v48 = vshrl.u32 %v703_v11, 16 }
 0x137   : > { %v959_v46 = vpop.f32.mrf.mxu0 }
 0x138   : > { %v1089_v56 = vadd.f32 %v1088_v8, %v959_v46  ;;  %v1457_v57 = vmul.f32 0.1, %v1425_v50  ;;  %v630_v8 = vsel %vm552_vm1, %v2332_v34, %v467_v14 }
 0x139   : > { %v701_v23 = vsel %vm649_vm2, %v630_v8, %v539_v9 }
 0x13a   : > { %v1093_v51 = vpop.f32.mrf.mxu1  ;;  %v1489_v35 = vmax.f32 %v1425_v50, %v1457_v57  ;;  %v843_v24 = vshll.u32 %v701_v23, 16  ;;  %v1226_v27 = vrot.slane %v701_v23, 1  ;;  %v636_v50 = vsel %vm552_vm1, %v2372_v29, %v471_v31 }
 0x13b   : > { %v1317_v52 = vpop.f32.mrf.mxu2  ;;  %v851_v57 = vrot.slane %v849_v19, 1 }
 0x13c   : > { %v1390_v53 = vadd.f32 %v1317_v52, %v1089_v56  ;;  %v1227_v42 = vsel %vm1188_vm4, %v1225_v30, %v1226_v27  ;;  %v543_v56 = vpop.permute.xlu1 %542 }
 0x13e   : > { %v1426_v58 = vadd.f32 %v2494_v21, %v1390_v53  ;;  %v705_v53 = vsel %vm649_vm2, %v636_v50, %v543_v56  ;;  %v473_v59 = vpop.permute.xlu2 %472 }
 0x13f   : > { %v962_v22 = vpop.f32.mrf.mxu0  ;;  %v1229_v14 = vrot.slane %v705_v53, 1 }
 0x140   : > { %v1458_v3 = vmul.f32 0.1, %v1426_v58  ;;  %1937 = vmatmul.msk.bf16.gmra.mxu2 %vm885_vm3, %v1224_v63  ;;  %v1092_v12 = vadd.f32 %v1091_v10, %v962_v22  ;;  %v845_v10 = vrot.slane %v843_v24, 1  ;;  %v1228_v63 = vrot.slane %v703_v11, 1 }
 0x142   : > { %v1490_v4 = vmax.f32 %v1426_v58, %v1458_v3  ;;  %1895 = vmatmul.msk.bf16.gmra.mxu0 %vm885_vm3, %v836_v1  ;;  %v1096_v54 = vpop.f32.mrf.mxu1  ;;  %v846_v46 = vsel %vm716_vm5, %v842_v36, %v845_v10  ;;  %v853_v58 = vshll.u32 %v705_v53, 16 }
 0x143   : > { %v1320_v2 = vpop.f32.mrf.mxu2 }
 0x144   : > { %v1519_v13 = vpack.c.bf16 %v1490_v4, %v1489_v35  ;;  %v1391_v16 = vadd.f32 %v1320_v2, %v1092_v12  ;;  %v852_v35 = vor.u32 %v851_v57, %v847_v48  ;;  %v855_v4 = vrot.slane %v853_v58, 1  ;;  %v545_v8 = vpop.permute.xlu1 %544 }
 0x145   : > { %1916 = vmatmul.msk.bf16.gmra.mxu1 %vm885_vm3, %v699_v5  ;;  %v639_v2 = vsel %vm552_vm1, %v2390_v41, %v473_v59  ;;  %v1230_v12 = vsel %vm1188_vm4, %v1228_v63, %v1229_v14 }
 0x146   : > { %1944 = vmatmul.msk.bf16.gmra.mxu3 %vm649_vm2, %v1519_v13  ;;  %v1427_v7 = vadd.f32 %v2494_v21, %v1391_v16  ;;  %v475_v13 = vpop.permute.xlu0 %474  ;;  %v856_v16 = vsel %vm716_vm5, %v852_v35, %v855_v4  ;;  %v707_v38 = vsel %vm649_vm2, %v639_v2, %v545_v8  ;;  %v547_v25 = vpop.permute.xlu2 %546 }
 0x147   : > { %v964_v18 = vpop.f32.mrf.mxu0  ;;  %v642_v24 = vsel %vm552_vm1, %v2375_v32, %v475_v13  ;;  %v1231_v0 = vrot.slane %v707_v38, 1 }
 0x148   : > { %v1094_v34 = vadd.f32 %v1093_v51, %v964_v18  ;;  %v1459_v17 = vmul.f32 0.1, %v1427_v7  ;;  %v709_v27 = vsel %vm649_vm2, %v642_v24, %v547_v25 }
 0x149   : > { %v863_v10 = vshll.u32 %v709_v27, 16 }
 0x14a   : > { %v1098_v26 = vpop.f32.mrf.mxu1  ;;  %v1491_v47 = vmax.f32 %v1427_v7, %v1459_v17 }
 0x14b   : > { %v1322_v39 = vpop.f32.mrf.mxu2 }
 0x14c   : > { %v1392_v28 = vadd.f32 %v1322_v39, %v1094_v34 }
 0x14e   : > { %v1428_v62 = vadd.f32 %v2494_v21, %v1392_v28  ;;  %v857_v28 = vshrl.u32 %v707_v38, 16  ;;  %v477_v17 = vpop.permute.xlu0 %476 }
 0x14f   : > { %v967_v40 = vpop.f32.mrf.mxu0 }
 0x150   : > { %v1460_v45 = vmul.f32 0.1, %v1428_v62  ;;  %1938 = vmatmul.msk.bf16.gmra.mxu2 %vm885_vm3, %v1227_v42  ;;  %v1097_v51 = vadd.f32 %v1096_v54, %v967_v40  ;;  %v1232_v40 = vrot.slane %v709_v27, 1 }
 0x152   : > { %v1492_v49 = vmax.f32 %v1428_v62, %v1460_v45  ;;  %1896 = vmatmul.msk.bf16.gmra.mxu0 %vm885_vm3, %v846_v46  ;;  %v1101_v6 = vpop.f32.mrf.mxu1  ;;  %v865_v46 = vrot.slane %v863_v10, 1  ;;  %v1233_v50 = vsel %vm1188_vm4, %v1231_v0, %v1232_v40 }
 0x153   : > { %v1325_v44 = vpop.f32.mrf.mxu2 }
 0x154   : > { %v1520_v33 = vpack.c.bf16 %v1492_v49, %v1491_v47  ;;  %v1393_v52 = vadd.f32 %v1325_v44, %v1097_v51  ;;  %v549_v44 = vpop.permute.xlu2 %548  ;;  %v479_v51 = vpop.permute.xlu1 %478 }
 0x155   : > { %1917 = vmatmul.msk.bf16.gmra.mxu1 %vm885_vm3, %v703_v11  ;;  %v645_v11 = vsel %vm552_vm1, %v2394_v43, %v477_v17  ;;  %v648_v43 = vsel %vm552_vm1, %v2407_v60, %v479_v51 }
 0x156   : > { %1945 = vmatmul.msk.bf16.gmra.mxu3 %vm649_vm2, %v1520_v33  ;;  %v1429_v61 = vadd.f32 %v2494_v21, %v1393_v52  ;;  %v711_v53 = vsel %vm649_vm2, %v645_v11, %v549_v44  ;;  %v551_v57 = vpop.permute.xlu0 %550 }
 0x157   : > { %v969_v55 = vpop.f32.mrf.mxu0  ;;  %v867_v14 = vshrl.u32 %v711_v53, 16 }
 0x158   : > { %v1099_v29 = vadd.f32 %v1098_v26, %v969_v55  ;;  %v1461_v5 = vmul.f32 0.1, %v1429_v61  ;;  %v859_v26 = vshll.u32 %v707_v38, 16 }
 0x15a   : > { %v1103_v22 = vpop.f32.mrf.mxu1  ;;  %v1493_v23 = vmax.f32 %v1429_v61, %v1461_v5  ;;  %v861_v36 = vrot.slane %v859_v26, 1  ;;  %v869_v61 = vshll.u32 %v711_v53, 16  ;;  %v1234_v5 = vrot.slane %v711_v53, 1 }
 0x15b   : > { %v1327_v3 = vpop.f32.mrf.mxu2 }
 0x15c   : > { %v1394_v1 = vadd.f32 %v1327_v3, %v1099_v29  ;;  %v862_v45 = vor.u32 %v861_v36, %v857_v28  ;;  %v871_v3 = vrot.slane %v869_v61, 1 }
 0x15e   : > { %v1430_v54 = vadd.f32 %v2494_v21, %v1394_v1  ;;  %v866_v33 = vsel %vm716_vm5, %v862_v45, %v865_v46 }
 0x15f   : > { %v972_v9 = vpop.f32.mrf.mxu0 }
 0x160   : > { %v1462_v15 = vmul.f32 0.1, %v1430_v54  ;;  %1939 = vmatmul.msk.bf16.gmra.mxu2 %vm885_vm3, %v1230_v12  ;;  %v1102_v7 = vadd.f32 %v1101_v6, %v972_v9  ;;  %v872_v9 = vor.u32 %v871_v3, %v867_v14 }
 0x162   : > { %v1494_v18 = vmax.f32 %v1430_v54, %v1462_v15  ;;  %1897 = vmatmul.msk.bf16.gmra.mxu0 %vm885_vm3, %v856_v16  ;;  %v1106_v20 = vpop.f32.mrf.mxu1 }
 0x163   : > { %v1330_v41 = vpop.f32.mrf.mxu2 }
 0x164   : > { %v1521_v34 = vpack.c.bf16 %v1494_v18, %v1493_v23  ;;  %v1395_v30 = vadd.f32 %v1330_v41, %v1102_v7 }
 0x165   : > { %1918 = vmatmul.msk.bf16.gmra.mxu1 %vm885_vm3, %v707_v38 }
 0x166   : > { %1946 = vmatmul.msk.bf16.gmra.mxu3 %vm649_vm2, %v1521_v34  ;;  %v1431_v62 = vadd.f32 %v2494_v21, %v1395_v30 }
 0x167   : > { %v974_v39 = vpop.f32.mrf.mxu0 }
 0x168   : > { %v1104_v32 = vadd.f32 %v1103_v22, %v974_v39  ;;  %v1463_v47 = vmul.f32 0.1, %v1431_v62  ;;  %v713_v22 = vsel %vm649_vm2, %v648_v43, %v551_v57 }
 0x169   : > { %v873_v1 = vshll.u32 %v713_v22, 16  ;;  %v1235_v54 = vrot.slane %v713_v22, 1 }
 0x16a   : > { %v1108_v37 = vpop.f32.mrf.mxu1  ;;  %v1495_v19 = vmax.f32 %v1431_v62, %v1463_v47 }
 0x16b   : > { %v1332_v42 = vpop.f32.mrf.mxu2  ;;  %v875_v12 = vrot.slane %v873_v1, 1  ;;  %v1236_v23 = vsel %vm1188_vm4, %v1234_v5, %v1235_v54 }
 0x16c   : > { %v1396_v31 = vadd.f32 %v1332_v42, %v1104_v32 }
 0x16d   : > { %v876_v38 = vsel %vm716_vm5, %v872_v9, %v875_v12 }
 0x16e   : > { %v1432_v49 = vadd.f32 %v2494_v21, %v1396_v31 }
 0x16f   : > { %v977_v6 = vpop.f32.mrf.mxu0 }
 0x170   : > { %v1464_v56 = vmul.f32 0.1, %v1432_v49  ;;  %1940 = vmatmul.msk.bf16.gmra.mxu2 %vm885_vm3, %v1233_v50  ;;  %v1107_v58 = vadd.f32 %v1106_v20, %v977_v6 }
 0x172   : > { %v1496_v52 = vmax.f32 %v1432_v49, %v1464_v56  ;;  %1898 = vmatmul.msk.bf16.gmra.mxu0 %vm885_vm3, %v866_v33  ;;  %v1111_v55 = vpop.f32.mrf.mxu1 }
 0x173   : > { %v1335_v48 = vpop.f32.mrf.mxu2 }
 0x174   : > { %v1522_v59 = vpack.c.bf16 %v1496_v52, %v1495_v19  ;;  %v1397_v29 = vadd.f32 %v1335_v48, %v1107_v58 }
 0x175   : > { %1919 = vmatmul.msk.bf16.gmra.mxu1 %vm885_vm3, %v711_v53 }
 0x176   : > { %1947 = vmatmul.msk.bf16.gmra.mxu3 %vm649_vm2, %v1522_v59  ;;  %v1433_v35 = vadd.f32 %v2494_v21, %v1397_v29 }
 0x177   : > { %v979_v63 = vpop.f32.mrf.mxu0 }
 0x178   : > { %v1109_v4 = vadd.f32 %v1108_v37, %v979_v63  ;;  %v1465_v13 = vmul.f32 0.1, %v1433_v35 }
 0x17a   : > { %v1113_v60 = vpop.f32.mrf.mxu1  ;;  %v1497_v20 = vmax.f32 %v1433_v35, %v1465_v13 }
 0x17b   : > { %v1337_v8 = vpop.f32.mrf.mxu2 }
 0x17c   : > { %v1398_v2 = vadd.f32 %v1337_v8, %v1109_v4  ;;  %v2598_v4 = vld [vmem:[%s2681_s4] ss:$0 sm:$0xff] }
 0x17e   : > { %v1434_v15 = vadd.f32 %v2494_v21, %v1398_v2 }
 0x17f   : > { %v982_v16 = vpop.f32.mrf.mxu0 }
 0x180   : > { %v1466_v18 = vmul.f32 0.1, %v1434_v15  ;;  %1941 = vmatmul.msk.bf16.gmra.mxu2 %vm885_vm3, %v1236_v23  ;;  %v1112_v7 = vadd.f32 %v1111_v55, %v982_v16 }
 0x182   : > { %v1498_v24 = vmax.f32 %v1434_v15, %v1466_v18  ;;  %1899 = vmatmul.msk.bf16.gmra.mxu0 %vm885_vm3, %v876_v38  ;;  %v1116_v41 = vpop.f32.mrf.mxu1 }
 0x183   : > { %v1340_v25 = vpop.f32.mrf.mxu2 }
 0x184   : > { %v1523_v34 = vpack.c.bf16 %v1498_v24, %v1497_v20  ;;  %v1399_v26 = vadd.f32 %v1340_v25, %v1112_v7 }
 0x186   : > { %1948 = vmatmul.msk.bf16.gmra.mxu3 %vm649_vm2, %v1523_v34  ;;  %v1435_v27 = vadd.f32 %v2494_v21, %v1399_v26 }
 0x187   : > { %v984_v30 = vpop.f32.mrf.mxu0 }
 0x188   : > { %v1114_v39 = vadd.f32 %v1113_v60, %v984_v30  ;;  %v1467_v17 = vmul.f32 0.1, %v1435_v27 }
 0x18a   : > { %v1118_v28 = vpop.f32.mrf.mxu1  ;;  %v1499_v0 = vmax.f32 %v1435_v27, %v1467_v17 }
 0x18b   : > { %v1342_v36 = vpop.f32.mrf.mxu2 }
 0x18c   : > { %v1400_v10 = vadd.f32 %v1342_v36, %v1114_v39 }
 0x18e   : > { %v1436_v62 = vadd.f32 %v2494_v21, %v1400_v10 }
 0x18f   : > { %v987_v32 = vpop.f32.mrf.mxu0 }
 0x190   : > { %v1468_v37 = vmul.f32 0.1, %v1436_v62  ;;  %v1117_v45 = vadd.f32 %v1116_v41, %v987_v32 }
 0x192   : > { %v1500_v40 = vmax.f32 %v1436_v62, %v1468_v37  ;;  %v1121_v42 = vpop.f32.mrf.mxu1 }
 0x193   : > { %v1345_v31 = vpop.f32.mrf.mxu2 }
 0x194   : > { %v1524_v46 = vpack.c.bf16 %v1500_v40, %v1499_v0  ;;  %v1401_v47 = vadd.f32 %v1345_v31, %v1117_v45 }
 0x196   : > { %1949 = vmatmul.msk.bf16.gmra.mxu3 %vm649_vm2, %v1524_v46  ;;  %v1437_v11 = vadd.f32 %v2494_v21, %v1401_v47 }
 0x197   : > { %v989_v49 = vpop.f32.mrf.mxu0 }
 0x198   : > { %v1119_v6 = vadd.f32 %v1118_v28, %v989_v49  ;;  %v1469_v51 = vmul.f32 0.1, %v1437_v11 }
 0x19a   : > { %v1123_v50 = vpop.f32.mrf.mxu1  ;;  %v1501_v53 = vmax.f32 %v1437_v11, %v1469_v51 }
 0x19b   : > { %v1347_v44 = vpop.f32.mrf.mxu2 }
 0x19c   : > { %v1402_v56 = vadd.f32 %v1347_v44, %v1119_v6 }
 0x19e   : > { %v1438_v33 = vadd.f32 %v2494_v21, %v1402_v56 }
 0x19f   : > { %v992_v19 = vpop.f32.mrf.mxu0 }
 0x1a0   : > { %v1470_v52 = vmul.f32 0.1, %v1438_v33  ;;  %v1122_v57 = vadd.f32 %v1121_v42, %v992_v19 }
 0x1a2   : > { %v1502_v55 = vmax.f32 %v1438_v33, %v1470_v52  ;;  %v1126_v43 = vpop.f32.mrf.mxu1 }
 0x1a3   : > { %v1350_v48 = vpop.f32.mrf.mxu2 }
 0x1a4   : > { %v1525_v58 = vpack.c.bf16 %v1502_v55, %v1501_v53  ;;  %v1403_v59 = vadd.f32 %v1350_v48, %v1122_v57 }
 0x1a6   : > { %1950 = vmatmul.msk.bf16.gmra.mxu3 %vm649_vm2, %v1525_v58  ;;  %v1439_v22 = vadd.f32 %v2494_v21, %v1403_v59 }
 0x1a7   : > { %v994_v61 = vpop.f32.mrf.mxu0 }
 0x1a8   : > { %v1124_v63 = vadd.f32 %v1123_v50, %v994_v61  ;;  %v1471_v35 = vmul.f32 0.1, %v1439_v22 }
 0x1a9   : > { %v1599_v29 = vpop.f32.mrf.mxu3 }
 0x1aa   : > { %v1128_v14 = vpop.f32.mrf.mxu1  ;;  %v1503_v2 = vmax.f32 %v1439_v22, %v1471_v35  ;;  %v1600_v9 = vadd.f32 %v2598_v4, %v1599_v29 }
 0x1ab   : > { %v1352_v3 = vpop.f32.mrf.mxu2 }
 0x1ac   : > { %v1404_v1 = vadd.f32 %v1352_v3, %v1124_v63 }
 0x1ae   : > { %v1440_v60 = vadd.f32 %v2494_v21, %v1404_v1 }
 0x1af   : > { %v997_v5 = vpop.f32.mrf.mxu0 }
 0x1b0   : > { %v1472_v54 = vmul.f32 0.1, %v1440_v60  ;;  %v1127_v23 = vadd.f32 %v1126_v43, %v997_v5 }
 0x1b1   : > { %v1601_v8 = vpop.f32.mrf.mxu3 }
 0x1b2   : > { %v1504_v12 = vmax.f32 %v1440_v60, %v1472_v54  ;;  %v1602_v13 = vadd.f32 %v2598_v4, %v1601_v8  ;;  %v1131_v15 = vpop.f32.mrf.mxu1 }
 0x1b3   : > { %v1355_v16 = vpop.f32.mrf.mxu2 }
 0x1b4   : > { %v1985_v18 = vpack.c.bf16 %v1602_v13, %v1600_v9  ;;  %v1526_v38 = vpack.c.bf16 %v1504_v12, %v1503_v2  ;;  %v1405_v20 = vadd.f32 %v1355_v16, %v1127_v23 }
 0x1b6   : > { %1986 = vst [vmem:[%s2607_s24] sm:$0xff] %v1985_v18   ;;  %1951 = vmatmul.msk.bf16.gmra.mxu3 %vm649_vm2, %v1526_v38  ;;  %v1441_v25 = vadd.f32 %v2494_v21, %v1405_v20 }
 0x1b7   : > { %v999_v24 = vpop.f32.mrf.mxu0 }
 0x1b8   : > { %v1129_v7 = vadd.f32 %v1128_v14, %v999_v24  ;;  %v1473_v27 = vmul.f32 0.1, %v1441_v25 }
 0x1b9   : > { %v1604_v41 = vpop.f32.mrf.mxu3 }
 0x1ba   : > { %v1133_v34 = vpop.f32.mrf.mxu1  ;;  %v1505_v17 = vmax.f32 %v1441_v25, %v1473_v27  ;;  %v1605_v62 = vadd.f32 %v2598_v4, %v1604_v41 }
 0x1bb   : > { %v1357_v26 = vpop.f32.mrf.mxu2 }
 0x1bc   : > { %v1406_v30 = vadd.f32 %v1357_v26, %v1129_v7 }
 0x1be   : > { %v1442_v39 = vadd.f32 %v2494_v21, %v1406_v30 }
 0x1bf   : > { %v1002_v28 = vpop.f32.mrf.mxu0 }
 0x1c0   : > { %v1474_v36 = vmul.f32 0.1, %v1442_v39  ;;  %v1132_v42 = vadd.f32 %v1131_v15, %v1002_v28 }
 0x1c1   : > { %v1606_v10 = vpop.f32.mrf.mxu3 }
 0x1c2   : > { %v1506_v32 = vmax.f32 %v1442_v39, %v1474_v36  ;;  %v1607_v37 = vadd.f32 %v2598_v4, %v1606_v10  ;;  %v1136_v0 = vpop.f32.mrf.mxu1 }
 0x1c3   : > { %v1360_v40 = vpop.f32.mrf.mxu2 }
 0x1c4   : > { %v1990_v31 = vpack.c.bf16 %v1607_v37, %v1605_v62  ;;  %v1527_v45 = vpack.c.bf16 %v1506_v32, %v1505_v17  ;;  %v1407_v46 = vadd.f32 %v1360_v40, %v1132_v42 }
 0x1c6   : > { %2062 = vst [vmem:[%s2607_s24 + $0x8] sm:$0xff] %v1990_v31   ;;  %1952 = vmatmul.msk.bf16.gmra.mxu3 %vm649_vm2, %v1527_v45  ;;  %v1443_v11 = vadd.f32 %v2494_v21, %v1407_v46 }
 0x1c7   : > { %v1004_v47 = vpop.f32.mrf.mxu0 }
 0x1c8   : > { %v1134_v6 = vadd.f32 %v1133_v34, %v1004_v47  ;;  %v1475_v51 = vmul.f32 0.1, %v1443_v11 }
 0x1c9   : > { %v1609_v49 = vpop.f32.mrf.mxu3 }
 0x1ca   : > { %v1138_v56 = vpop.f32.mrf.mxu1  ;;  %v1507_v55 = vmax.f32 %v1443_v11, %v1475_v51  ;;  %v1610_v43 = vadd.f32 %v2598_v4, %v1609_v49 }
 0x1cb   : > { %v1362_v50 = vpop.f32.mrf.mxu2 }
 0x1cc   : > { %v1408_v44 = vadd.f32 %v1362_v50, %v1134_v6 }
 0x1ce   : > { %v1444_v33 = vadd.f32 %v2494_v21, %v1408_v44 }
 0x1cf   : > { %v1007_v19 = vpop.f32.mrf.mxu0 }
 0x1d0   : > { %v1476_v52 = vmul.f32 0.1, %v1444_v33  ;;  %v1137_v59 = vadd.f32 %v1136_v0, %v1007_v19 }
 0x1d1   : > { %v1611_v53 = vpop.f32.mrf.mxu3 }
 0x1d2   : > { %v1508_v48 = vmax.f32 %v1444_v33, %v1476_v52  ;;  %v1612_v57 = vadd.f32 %v2598_v4, %v1611_v53  ;;  %v1141_v63 = vpop.f32.mrf.mxu1 }
 0x1d3   : > { %v1365_v58 = vpop.f32.mrf.mxu2 }
 0x1d4   : > { %v1995_v61 = vpack.c.bf16 %v1612_v57, %v1610_v43  ;;  %v1528_v29 = vpack.c.bf16 %v1508_v48, %v1507_v55  ;;  %v1409_v22 = vadd.f32 %v1365_v58, %v1137_v59 }
 0x1d6   : > { %2063 = vst [vmem:[%s2607_s24 + $0x10] sm:$0xff] %v1995_v61   ;;  %1953 = vmatmul.msk.bf16.gmra.mxu3 %vm649_vm2, %v1528_v29  ;;  %v1445_v1 = vadd.f32 %v2494_v21, %v1409_v22 }
 0x1d7   : > { %v1009_v14 = vpop.f32.mrf.mxu0 }
 0x1d8   : > { %v1139_v35 = vadd.f32 %v1138_v56, %v1009_v14  ;;  %v1477_v54 = vmul.f32 0.1, %v1445_v1 }
 0x1d9   : > { %v1614_v3 = vpop.f32.mrf.mxu3 }
 0x1da   : > { %v1143_v12 = vpop.f32.mrf.mxu1  ;;  %v1509_v15 = vmax.f32 %v1445_v1, %v1477_v54  ;;  %v1615_v16 = vadd.f32 %v2598_v4, %v1614_v3 }
 0x1db   : > { %v1367_v60 = vpop.f32.mrf.mxu2 }
 0x1dc   : > { %v1410_v5 = vadd.f32 %v1367_v60, %v1139_v35 }
 0x1de   : > { %v1446_v8 = vadd.f32 %v2494_v21, %v1410_v5 }
 0x1df   : > { %v1012_v2 = vpop.f32.mrf.mxu0 }
 0x1e0   : > { %v1478_v9 = vmul.f32 0.1, %v1446_v8  ;;  %v1142_v24 = vadd.f32 %v1141_v63, %v1012_v2 }
 0x1e1   : > { %v1616_v13 = vpop.f32.mrf.mxu3 }
 0x1e2   : > { %v1510_v23 = vmax.f32 %v1446_v8, %v1478_v9  ;;  %v1617_v18 = vadd.f32 %v2598_v4, %v1616_v13  ;;  %v1146_v27 = vpop.f32.mrf.mxu1 }
 0x1e3   : > { %v1370_v38 = vpop.f32.mrf.mxu2 }
 0x1e4   : > { %v1529_v20 = vpack.c.bf16 %v1510_v23, %v1509_v15  ;;  %v2000_v41 = vpack.c.bf16 %v1617_v18, %v1615_v16  ;;  %v1411_v25 = vadd.f32 %v1370_v38, %v1142_v24 }
 0x1e6   : > { %2064 = vst [vmem:[%s2607_s24 + $0x18] sm:$0xff] %v2000_v41   ;;  %1954 = vmatmul.msk.bf16.gmra.mxu3 %vm649_vm2, %v1529_v20  ;;  %v1447_v26 = vadd.f32 %v2494_v21, %v1411_v25 }
 0x1e7   : > { %v1014_v7 = vpop.f32.mrf.mxu0 }
 0x1e8   : > { %v1144_v30 = vadd.f32 %v1143_v12, %v1014_v7  ;;  %v1479_v36 = vmul.f32 0.1, %v1447_v26 }
 0x1e9   : > { %v1619_v34 = vpop.f32.mrf.mxu3 }
 0x1ea   : > { %v1511_v37 = vmax.f32 %v1447_v26, %v1479_v36  ;;  %v1620_v0 = vadd.f32 %v2598_v4, %v1619_v34  ;;  %v1148_v49 = vpop.f32.mrf.mxu1 }
 0x1eb   : > { %v1372_v39 = vpop.f32.mrf.mxu2 }
 0x1ec   : > { %v1412_v28 = vadd.f32 %v1372_v39, %v1144_v30 }
 0x1ee   : > { %v1448_v10 = vadd.f32 %v2494_v21, %v1412_v28 }
 0x1ef   : > { %v1017_v17 = vpop.f32.mrf.mxu0 }
 0x1f0   : > { %v1480_v62 = vmul.f32 0.1, %v1448_v10  ;;  %v1147_v46 = vadd.f32 %v1146_v27, %v1017_v17 }
 0x1f1   : > { %v1621_v32 = vpop.f32.mrf.mxu3 }
 0x1f2   : > { %v1512_v40 = vmax.f32 %v1448_v10, %v1480_v62  ;;  %v1622_v42 = vadd.f32 %v2598_v4, %v1621_v32  ;;  %v1151_v53 = vpop.f32.mrf.mxu1 }
 0x1f3   : > { %v1375_v31 = vpop.f32.mrf.mxu2 }
 0x1f4   : > { %v1530_v45 = vpack.c.bf16 %v1512_v40, %v1511_v37  ;;  %v2005_v47 = vpack.c.bf16 %v1622_v42, %v1620_v0  ;;  %v1413_v11 = vadd.f32 %v1375_v31, %v1147_v46 }
 0x1f6   : > { %2065 = vst [vmem:[%s2607_s24 + $0x20] sm:$0xff] %v2005_v47   ;;  %1955 = vmatmul.msk.bf16.gmra.mxu3 %vm649_vm2, %v1530_v45  ;;  %v1449_v44 = vadd.f32 %v2494_v21, %v1413_v11 }
 0x1f7   : > { %v1019_v6 = vpop.f32.mrf.mxu0 }
 0x1f8   : > { %v1149_v56 = vadd.f32 %v1148_v49, %v1019_v6  ;;  %v1481_v19 = vmul.f32 0.1, %v1449_v44 }
 0x1f9   : > { %v1624_v50 = vpop.f32.mrf.mxu3 }
 0x1fa   : > { %v1513_v57 = vmax.f32 %v1449_v44, %v1481_v19  ;;  %v1625_v58 = vadd.f32 %v2598_v4, %v1624_v50  ;;  %v1153_v35 = vpop.f32.mrf.mxu1 }
 0x1fb   : > { %v1377_v51 = vpop.f32.mrf.mxu2 }
 0x1fc   : > { %v1414_v33 = vadd.f32 %v1377_v51, %v1149_v56 }
 0x1fe   : > { %v1450_v52 = vadd.f32 %v2494_v21, %v1414_v33 }
 0x1ff   : > { %v1022_v55 = vpop.f32.mrf.mxu0 }
 0x200   : > { %v1482_v43 = vmul.f32 0.1, %v1450_v52  ;;  %v1152_v63 = vadd.f32 %v1151_v53, %v1022_v55 }
 0x201   : > { %v1626_v48 = vpop.f32.mrf.mxu3 }
 0x202   : > { %v1514_v59 = vmax.f32 %v1450_v52, %v1482_v43  ;;  %v1627_v61 = vadd.f32 %v2598_v4, %v1626_v48 }
 0x203   : > { %v1380_v29 = vpop.f32.mrf.mxu2 }
 0x204   : > { %v1531_v22 = vpack.c.bf16 %v1514_v59, %v1513_v57  ;;  %v2010_v14 = vpack.c.bf16 %v1627_v61, %v1625_v58  ;;  %v1415_v3 = vadd.f32 %v1380_v29, %v1152_v63 }
 0x206   : > { %2066 = vst [vmem:[%s2607_s24 + $0x28] sm:$0xff] %v2010_v14   ;;  %1956 = vmatmul.msk.bf16.gmra.mxu3 %vm649_vm2, %v1531_v22  ;;  %v1451_v5 = vadd.f32 %v2494_v21, %v1415_v3 }
 0x207   : > { %v1024_v1 = vpop.f32.mrf.mxu0 }
 0x208   : > { %v1154_v54 = vadd.f32 %v1153_v35, %v1024_v1  ;;  %v1483_v9 = vmul.f32 0.1, %v1451_v5 }
 0x209   : > { %v1629_v60 = vpop.f32.mrf.mxu3 }
 0x20a   : > { %v1515_v16 = vmax.f32 %v1451_v5, %v1483_v9  ;;  %v1630_v23 = vadd.f32 %v2598_v4, %v1629_v60 }
 0x20b   : > { %v1382_v8 = vpop.f32.mrf.mxu2 }
 0x20c   : > { %v1416_v2 = vadd.f32 %v1382_v8, %v1154_v54 }
 0x20e   : > { %v1452_v12 = vadd.f32 %v2494_v21, %v1416_v2 }
 0x210   : > { %v1484_v13 = vmul.f32 0.1, %v1452_v12 }
 0x211   : > { %v1631_v15 = vpop.f32.mrf.mxu3 }
 0x212   : > { %v1516_v18 = vmax.f32 %v1452_v12, %v1484_v13  ;;  %v1632_v38 = vadd.f32 %v2598_v4, %v1631_v15 }
 0x214   : > { %v1532_v20 = vpack.c.bf16 %v1516_v18, %v1515_v16  ;;  %v2015_v24 = vpack.c.bf16 %v1632_v38, %v1630_v23 }
 0x216   : > { %2067 = vst [vmem:[%s2607_s24 + $0x30] sm:$0xff] %v2015_v24   ;;  %1957 = vmatmul.msk.bf16.gmra.mxu3 %vm649_vm2, %v1532_v20 }
 0x219   : > { %v1634_v41 = vpop.f32.mrf.mxu3 }
 0x21a   : > { %v1635_v21 = vadd.f32 %v2598_v4, %v1634_v41 }
 0x221   : > { %v1636_v25 = vpop.f32.mrf.mxu3 }
 0x222   : > { %v1637_v7 = vadd.f32 %v2598_v4, %v1636_v25 }
 0x224   : > { %v2020_v34 = vpack.c.bf16 %v1637_v7, %v1635_v21 }
 0x226   : > { %2068 = vst [vmem:[%s2607_s24 + $0x38] sm:$0xff] %v2020_v34  }
 0x229   : > { %v1639_v26 = vpop.f32.mrf.mxu3 }
 0x22a   : > { %v1640_v27 = vadd.f32 %v2598_v4, %v1639_v26 }
 0x231   : > { %v1641_v30 = vpop.f32.mrf.mxu3 }
 0x232   : > { %v1642_v39 = vadd.f32 %v2598_v4, %v1641_v30 }
 0x234   : > { %v2025_v28 = vpack.c.bf16 %v1642_v39, %v1640_v27 }
 0x236   : > { %2069 = vst [vmem:[%s2607_s24 + $0x40] sm:$0xff] %v2025_v28  }
 0x239   : > { %v1644_v36 = vpop.f32.mrf.mxu3 }
 0x23a   : > { %v1645_v17 = vadd.f32 %v2598_v4, %v1644_v36 }
 0x241   : > { %v1646_v10 = vpop.f32.mrf.mxu3 }
 0x242   : > { %v1647_v62 = vadd.f32 %v2598_v4, %v1646_v10 }
 0x244   : > { %v2030_v32 = vpack.c.bf16 %v1647_v62, %v1645_v17 }
 0x246   : > { %2070 = vst [vmem:[%s2607_s24 + $0x48] sm:$0xff] %v2030_v32  }
 0x249   : > { %v1649_v37 = vpop.f32.mrf.mxu3 }
 0x24a   : > { %v1650_v40 = vadd.f32 %v2598_v4, %v1649_v37 }
 0x251   : > { %v1651_v0 = vpop.f32.mrf.mxu3 }
 0x252   : > { %v1652_v42 = vadd.f32 %v2598_v4, %v1651_v0 }
 0x254   : > { %v2035_v31 = vpack.c.bf16 %v1652_v42, %v1650_v40 }
 0x256   : > { %2071 = vst [vmem:[%s2607_s24 + $0x50] sm:$0xff] %v2035_v31  }
 0x259   : > { %v1654_v45 = vpop.f32.mrf.mxu3 }
 0x25a   : > { %v1655_v47 = vadd.f32 %v2598_v4, %v1654_v45 }
 0x261   : > { %v1656_v46 = vpop.f32.mrf.mxu3 }
 0x262   : > { %v1657_v49 = vadd.f32 %v2598_v4, %v1656_v46 }
 0x264   : > { %v2040_v11 = vpack.c.bf16 %v1657_v49, %v1655_v47 }
 0x266   : > { %2072 = vst [vmem:[%s2607_s24 + $0x58] sm:$0xff] %v2040_v11  }
 0x269   : > { %v1659_v6 = vpop.f32.mrf.mxu3 }
 0x26a   : > { %v1660_v44 = vadd.f32 %v2598_v4, %v1659_v6 }
 0x271   : > { %v1661_v50 = vpop.f32.mrf.mxu3 }
 0x272   : > { %v1662_v56 = vadd.f32 %v2598_v4, %v1661_v50 }
 0x274   : > { %v2045_v51 = vpack.c.bf16 %v1662_v56, %v1660_v44 }
 0x276   : > { %2073 = vst [vmem:[%s2607_s24 + $0x60] sm:$0xff] %v2045_v51  }
 0x279   : > { %v1664_v33 = vpop.f32.mrf.mxu3 }
 0x27a   : > { %v1665_v52 = vadd.f32 %v2598_v4, %v1664_v33 }
 0x281   : > { %v1666_v19 = vpop.f32.mrf.mxu3 }
 0x282   : > { %v1667_v53 = vadd.f32 %v2598_v4, %v1666_v19 }
 0x284   : > { %v2050_v55 = vpack.c.bf16 %v1667_v53, %v1665_v52 }
 0x286   : > { %2074 = vst [vmem:[%s2607_s24 + $0x68] sm:$0xff] %v2050_v55  }
 0x289   : > { %v1669_v43 = vpop.f32.mrf.mxu3 }
 0x28a   : > { %v1670_v57 = vadd.f32 %v2598_v4, %v1669_v43 }
 0x291   : > { %v1671_v48 = vpop.f32.mrf.mxu3 }
 0x292   : > { %v1672_v58 = vadd.f32 %v2598_v4, %v1671_v48 }
 0x294   : > { %v2055_v59 = vpack.c.bf16 %v1672_v58, %v1670_v57 }
 0x296   : > { %2075 = vst [vmem:[%s2607_s24 + $0x70] sm:$0xff] %v2055_v59  }
 0x299   : > { %v1674_v61 = vpop.f32.mrf.mxu3 }
 0x29a   : > { %v1675_v22 = vadd.f32 %v2598_v4, %v1674_v61 }
 0x2a1   : > { %v1676_v29 = vpop.f32.mrf.mxu3 }
 0x2a2   : > { %v1677_v63 = vadd.f32 %v2598_v4, %v1676_v29 }
 0x2a4   : > { %v2060_v14 = vpack.c.bf16 %v1677_v63, %v1675_v22 }
 0x2a6   : > { %2076 = vst [vmem:[%s2607_s24 + $0x78] sm:$0xff] %v2060_v14  }
 0x2a7 PF: > { %s15_s18 = sadd.s32 1, %s2096_s18  }
 0x2a8   : > { %p12_p4 = scmp.ge.s32.totalorder %s15_s18, 4  }
 0x2aa   :  { %14 = sbr.rel (!%p12_p4) target bundleno = 1 (0x1), region = 72 }

</bundles_post_ra>
